<compile_context>
chip_gen: v7x
topology: tpu7x:2x2x1
jax: 0.10.0
libtpu: 0.0.40
codegen_flags: <defaults>
</compile_context>

<pallas_src>
import jax
import jax.numpy as jnp
from jax.experimental import pallas as pl
from jax.experimental.pallas import tpu as pltpu


def _conv3x3_relu(pad_ref, interior, w_ref, b_ref, C, H, W):
    """One 3x3 'same' conv + ReLU in W-folded (lane-dense) layout.

    pad_ref : (H+2, (W+2)*C) f32 VMEM scratch -- zero-padded input slab.
    interior: (H, W*C) f32 value -- unpadded activations, W*C on the lane axis.
    w_ref   : (3, 3, W*C, W*Cout) block-diagonal per-tap weights.
    b_ref   : (1, W*Cout) folded bias.
    returns : (H, W*Cout) f32 value.
    """
    WC = W * C
    co_fold = w_ref.shape[3]

    # Refresh the padded slab: zero only the 1-pixel border (tiny), then write
    # the interior.  Every element of the scratch is (re)written each step, so
    # no stale state is ever read (megacore-safe, no pl.when(pid==0) needed).
    zrow = jnp.zeros((1, (W + 2) * C), jnp.float32)
    pad_ref[0:1, :] = zrow
    pad_ref[H + 1:H + 2, :] = zrow
    zcol = jnp.zeros((H, C), jnp.float32)
    pad_ref[1:H + 1, 0:C] = zcol
    pad_ref[1:H + 1, (W + 1) * C:(W + 2) * C] = zcol
    pad_ref[1:H + 1, C:(W + 1) * C] = interior

    # 3 kx-shifted lane-offset slabs, each reused for all 3 ky taps.
    acc = jnp.zeros((H, co_fold), jnp.float32)
    for kx in range(3):
        slab = pad_ref[:, kx * C:kx * C + WC]          # (H+2, W*C)
        for ky in range(3):
            acc = acc + jnp.dot(slab[ky:ky + H, :], w_ref[ky, kx],
                                preferred_element_type=jnp.float32)
    return jnp.maximum(acc + b_ref[...], 0.0)


def _make_kernel(H, W, Cin, Cmid):
    def kernel(x_ref, w1_ref, b1_ref, w2_ref, b2_ref, o_ref,
               xpad_ref, mpad_ref):
        xf = x_ref[0]                                                # (H, W*Cin)
        y1 = _conv3x3_relu(xpad_ref, xf, w1_ref, b1_ref, Cin, H, W)  # (H, W*Cmid)
        y2 = _conv3x3_relu(mpad_ref, y1, w2_ref, b2_ref, Cmid, H, W) # (H, W*Cout)
        o_ref[...] = y2[None].astype(o_ref.dtype)                    # dense store
    return kernel


def _fold_weight(w_hwio, W):
    """(3,3,Ci,Co) HWIO -> (3,3,W*Ci,W*Co) block-diagonal over W positions so
    each 3x3 tap is a single lane-dense matmul with the output already folded."""
    KH, KW, Ci, Co = w_hwio.shape
    eye = jnp.eye(W, dtype=w_hwio.dtype)
    wb = jnp.einsum('ykcm,wv->ykwcvm', w_hwio, eye)
    return wb.reshape(KH, KW, W * Ci, W * Co)


def double_conv_pallas(x_nchw, w1_hwio, b1, w2_hwio, b2):
    """x_nchw: (N, Cin, H, W); weights in HWIO; returns (N, Cout, H, W)."""
    N, Cin, H, W = x_nchw.shape
    Cmid = w1_hwio.shape[3]
    Cout = w2_hwio.shape[3]

    # NCHW -> NHWC -> fold (W, C) onto the lane axis (the reshape is free).
    xf = jnp.transpose(x_nchw, (0, 2, 3, 1)).reshape(N, H, W * Cin)

    w1f = _fold_weight(w1_hwio, W)                    # (3,3,W*Cin, W*Cmid)
    w2f = _fold_weight(w2_hwio, W)                    # (3,3,W*Cmid, W*Cout)
    b1f = jnp.tile(b1, W).reshape(1, W * Cmid)
    b2f = jnp.tile(b2, W).reshape(1, W * Cout)

    out_f = pl.pallas_call(
        _make_kernel(H, W, Cin, Cmid),
        out_shape=jax.ShapeDtypeStruct((N, H, W * Cout), x_nchw.dtype),
        grid_spec=pltpu.PrefetchScalarGridSpec(
            num_scalar_prefetch=0,
            grid=(N,),
            in_specs=[
                pl.BlockSpec((1, H, W * Cin), lambda n: (n, 0, 0)),
                pl.BlockSpec((3, 3, W * Cin, W * Cmid), lambda n: (0, 0, 0, 0)),
                pl.BlockSpec((1, W * Cmid), lambda n: (0, 0)),
                pl.BlockSpec((3, 3, W * Cmid, W * Cout), lambda n: (0, 0, 0, 0)),
                pl.BlockSpec((1, W * Cout), lambda n: (0, 0)),
            ],
            out_specs=pl.BlockSpec((1, H, W * Cout), lambda n: (n, 0, 0)),
            scratch_shapes=[
                pltpu.VMEM((H + 2, (W + 2) * Cin), jnp.float32),
                pltpu.VMEM((H + 2, (W + 2) * Cmid), jnp.float32),
            ],
        ),
        compiler_params=pltpu.CompilerParams(
            dimension_semantics=("parallel",)),
    )(xf, w1f, b1f, w2f, b2f)

    # (N, H, W*Cout) -> NHWC -> NCHW
    return jnp.transpose(out_f.reshape(N, H, W, Cout), (0, 3, 1, 2))


def _reference(x, w1_oihw, b1, w2_oihw, b2):
    """Plain-JAX reference matching PyTorch Conv2d semantics (NCHW/OIHW)."""
    y = jax.lax.conv_general_dilated(
        x, w1_oihw, (1, 1), ((1, 1), (1, 1)),
        dimension_numbers=('NCHW', 'OIHW', 'NCHW'))
    y = jnp.maximum(y + b1[None, :, None, None], 0.0)
    y = jax.lax.conv_general_dilated(
        y, w2_oihw, (1, 1), ((1, 1), (1, 1)),
        dimension_numbers=('NCHW', 'OIHW', 'NCHW'))
    y = jnp.maximum(y + b2[None, :, None, None], 0.0)
    return y


if __name__ == "__main__":
    N, Cin, Cout, H, W = 2, 4, 8, 16, 16

    key = jax.random.PRNGKey(0)
    kx, kw1, kb1, kw2, kb2 = jax.random.split(key, 5)

    x = jax.random.normal(kx, (N, Cin, H, W), jnp.float32)

    # PyTorch-style (OIHW) weights, kaiming-uniform-ish deterministic init
    bound1 = 1.0 / (Cin * 9) ** 0.5
    w1_oihw = jax.random.uniform(kw1, (Cout, Cin, 3, 3), jnp.float32,
                                 -bound1, bound1)
    b1 = jax.random.uniform(kb1, (Cout,), jnp.float32, -bound1, bound1)
    bound2 = 1.0 / (Cout * 9) ** 0.5
    w2_oihw = jax.random.uniform(kw2, (Cout, Cout, 3, 3), jnp.float32,
                                 -bound2, bound2)
    b2 = jax.random.uniform(kb2, (Cout,), jnp.float32, -bound2, bound2)

    # OIHW -> HWIO for the channels-last kernel
    w1_hwio = jnp.transpose(w1_oihw, (2, 3, 1, 0))
    w2_hwio = jnp.transpose(w2_oihw, (2, 3, 1, 0))

    out = double_conv_pallas(x, w1_hwio, b1, w2_hwio, b2)
    out = jax.block_until_ready(out)

    ref = jax.block_until_ready(_reference(x, w1_oihw, b1, w2_oihw, b2))
    assert out.shape == (N, Cout, H, W)
    assert jnp.allclose(out, ref, atol=1e-3, rtol=1e-3), "mismatch vs reference"

    print("KERNEL_OK")
</pallas_src>

<mosaic_0001>
module attributes {stable_mosaic.version = 11 : i64} {
  func.func @kernel(%arg0: i32, %arg1: memref<1x16x64xf32, #tpu.memory_space<vmem>>, %arg2: memref<3x3x64x128xf32, #tpu.memory_space<vmem>>, %arg3: memref<1x128xf32, #tpu.memory_space<vmem>>, %arg4: memref<3x3x128x128xf32, #tpu.memory_space<vmem>>, %arg5: memref<1x128xf32, #tpu.memory_space<vmem>>, %arg6: memref<1x16x128xf32, #tpu.memory_space<vmem>>, %arg7: memref<18x72xf32, #tpu.memory_space<vmem>>, %arg8: memref<18x144xf32, #tpu.memory_space<vmem>>) attributes {dimension_semantics = [#tpu.dimension_semantics<parallel>], iteration_bounds = array<i64: 2>, scalar_prefetch = 0 : i64, scratch_operands = 2 : i64, tpu.core_type = #tpu.core_type<tc>, window_params = [{transform_indices = @transform_0, window_bounds = array<i64: 1, 16, 64>}, {pipeline_mode = #tpu.pipeline_mode<synchronous>, transform_indices = @transform_1, window_bounds = array<i64: 3, 3, 64, 128>}, {pipeline_mode = #tpu.pipeline_mode<synchronous>, transform_indices = @transform_2, window_bounds = array<i64: 1, 128>}, {pipeline_mode = #tpu.pipeline_mode<synchronous>, transform_indices = @transform_3, window_bounds = array<i64: 3, 3, 128, 128>}, {pipeline_mode = #tpu.pipeline_mode<synchronous>, transform_indices = @transform_4, window_bounds = array<i64: 1, 128>}, {transform_indices = @transform_5, window_bounds = array<i64: 1, 16, 128>}]} {
    %c0 = arith.constant 0 : index
    %c0_0 = arith.constant 0 : index
    %c0_1 = arith.constant 0 : index
    %0 = vector.load %arg1[%c0, %c0_0, %c0_1] : memref<1x16x64xf32, #tpu.memory_space<vmem>>, vector<1x16x64xf32>
    %1 = vector.shape_cast %0 : vector<1x16x64xf32> to vector<16x64xf32>
    %cst = arith.constant 0.000000e+00 : f32
    %2 = vector.broadcast %cst : f32 to vector<1x72xf32>
    %c0_2 = arith.constant 0 : index
    %c0_3 = arith.constant 0 : index
    %3 = vector.load %arg7[%c0_2, %c0_3] : memref<18x72xf32, #tpu.memory_space<vmem>>, vector<1x72xf32>
    tpu.vector_store %arg7[%c0_2, %c0_3], %2 {strides = array<i32>} : memref<18x72xf32, #tpu.memory_space<vmem>>, vector<1x72xf32>,
    %c17 = arith.constant 17 : index
    %c0_4 = arith.constant 0 : index
    %4 = vector.load %arg7[%c17, %c0_4] : memref<18x72xf32, #tpu.memory_space<vmem>>, vector<1x72xf32>
    tpu.vector_store %arg7[%c17, %c0_4], %2 {strides = array<i32>} : memref<18x72xf32, #tpu.memory_space<vmem>>, vector<1x72xf32>,
    %cst_5 = arith.constant 0.000000e+00 : f32
    %5 = vector.broadcast %cst_5 : f32 to vector<16x4xf32>
    %c1 = arith.constant 1 : index
    %c0_6 = arith.constant 0 : index
    %6 = vector.load %arg7[%c1, %c0_6] : memref<18x72xf32, #tpu.memory_space<vmem>>, vector<16x4xf32>
    tpu.vector_store %arg7[%c1, %c0_6], %5 {strides = array<i32>} : memref<18x72xf32, #tpu.memory_space<vmem>>, vector<16x4xf32>,
    %c1_7 = arith.constant 1 : index
    %c68 = arith.constant 68 : index
    %7 = vector.load %arg7[%c1_7, %c68] : memref<18x72xf32, #tpu.memory_space<vmem>>, vector<16x4xf32>
    tpu.vector_store %arg7[%c1_7, %c68], %5 {strides = array<i32>} : memref<18x72xf32, #tpu.memory_space<vmem>>, vector<16x4xf32>,
    %c1_8 = arith.constant 1 : index
    %c4 = arith.constant 4 : index
    %8 = vector.load %arg7[%c1_8, %c4] : memref<18x72xf32, #tpu.memory_space<vmem>>, vector<16x64xf32>
    tpu.vector_store %arg7[%c1_8, %c4], %1 {strides = array<i32>} : memref<18x72xf32, #tpu.memory_space<vmem>>, vector<16x64xf32>,
    %cst_9 = arith.constant 0.000000e+00 : f32
    %9 = vector.broadcast %cst_9 : f32 to vector<16x128xf32>
    %c0_10 = arith.constant 0 : index
    %c0_11 = arith.constant 0 : index
    %10 = vector.load %arg7[%c0_10, %c0_11] : memref<18x72xf32, #tpu.memory_space<vmem>>, vector<18x64xf32>
    %11 = vector.extract_strided_slice %10 {offsets = [0, 0], sizes = [16, 64], strides = [1, 1]} : vector<18x64xf32> to vector<16x64xf32>
    %c0_12 = arith.constant 0 : index
    %c0_13 = arith.constant 0 : index
    %c0_14 = arith.constant 0 : index
    %c0_15 = arith.constant 0 : index
    %12 = vector.load %arg2[%c0_12, %c0_13, %c0_14, %c0_15] : memref<3x3x64x128xf32, #tpu.memory_space<vmem>>, vector<1x1x64x128xf32>
    %13 = vector.shape_cast %12 : vector<1x1x64x128xf32> to vector<64x128xf32>
    %cst_16 = arith.constant dense<0.000000e+00> : vector<16x128xf32>
    %14 = tpu.matmul %11, %13, %cst_16 {dimension_numbers = #tpu.dot_dimension_numbers<[1], [0], [0], [1], [0, 0, 1, 1], [], []>} : vector<16x64xf32>, vector<64x128xf32>, vector<16x128xf32> -> vector<16x128xf32>
    %15 = arith.addf %9, %14 : vector<16x128xf32>
    %16 = vector.extract_strided_slice %10 {offsets = [1, 0], sizes = [16, 64], strides = [1, 1]} : vector<18x64xf32> to vector<16x64xf32>
    %c1_17 = arith.constant 1 : index
    %c0_18 = arith.constant 0 : index
    %c0_19 = arith.constant 0 : index
    %c0_20 = arith.constant 0 : index
    %17 = vector.load %arg2[%c1_17, %c0_18, %c0_19, %c0_20] : memref<3x3x64x128xf32, #tpu.memory_space<vmem>>, vector<1x1x64x128xf32>
    %18 = vector.shape_cast %17 : vector<1x1x64x128xf32> to vector<64x128xf32>
    %cst_21 = arith.constant dense<0.000000e+00> : vector<16x128xf32>
    %19 = tpu.matmul %16, %18, %cst_21 {dimension_numbers = #tpu.dot_dimension_numbers<[1], [0], [0], [1], [0, 0, 1, 1], [], []>} : vector<16x64xf32>, vector<64x128xf32>, vector<16x128xf32> -> vector<16x128xf32>
    %20 = arith.addf %15, %19 : vector<16x128xf32>
    %21 = vector.extract_strided_slice %10 {offsets = [2, 0], sizes = [16, 64], strides = [1, 1]} : vector<18x64xf32> to vector<16x64xf32>
    %c2 = arith.constant 2 : index
    %c0_22 = arith.constant 0 : index
    %c0_23 = arith.constant 0 : index
    %c0_24 = arith.constant 0 : index
    %22 = vector.load %arg2[%c2, %c0_22, %c0_23, %c0_24] : memref<3x3x64x128xf32, #tpu.memory_space<vmem>>, vector<1x1x64x128xf32>
    %23 = vector.shape_cast %22 : vector<1x1x64x128xf32> to vector<64x128xf32>
    %cst_25 = arith.constant dense<0.000000e+00> : vector<16x128xf32>
    %24 = tpu.matmul %21, %23, %cst_25 {dimension_numbers = #tpu.dot_dimension_numbers<[1], [0], [0], [1], [0, 0, 1, 1], [], []>} : vector<16x64xf32>, vector<64x128xf32>, vector<16x128xf32> -> vector<16x128xf32>
    %25 = arith.addf %20, %24 : vector<16x128xf32>
    %c0_26 = arith.constant 0 : index
    %c4_27 = arith.constant 4 : index
    %26 = vector.load %arg7[%c0_26, %c4_27] : memref<18x72xf32, #tpu.memory_space<vmem>>, vector<18x64xf32>
    %27 = vector.extract_strided_slice %26 {offsets = [0, 0], sizes = [16, 64], strides = [1, 1]} : vector<18x64xf32> to vector<16x64xf32>
    %c0_28 = arith.constant 0 : index
    %c1_29 = arith.constant 1 : index
    %c0_30 = arith.constant 0 : index
    %c0_31 = arith.constant 0 : index
    %28 = vector.load %arg2[%c0_28, %c1_29, %c0_30, %c0_31] : memref<3x3x64x128xf32, #tpu.memory_space<vmem>>, vector<1x1x64x128xf32>
    %29 = vector.shape_cast %28 : vector<1x1x64x128xf32> to vector<64x128xf32>
    %cst_32 = arith.constant dense<0.000000e+00> : vector<16x128xf32>
    %30 = tpu.matmul %27, %29, %cst_32 {dimension_numbers = #tpu.dot_dimension_numbers<[1], [0], [0], [1], [0, 0, 1, 1], [], []>} : vector<16x64xf32>, vector<64x128xf32>, vector<16x128xf32> -> vector<16x128xf32>
    %31 = arith.addf %25, %30 : vector<16x128xf32>
    %32 = vector.extract_strided_slice %26 {offsets = [1, 0], sizes = [16, 64], strides = [1, 1]} : vector<18x64xf32> to vector<16x64xf32>
    %c1_33 = arith.constant 1 : index
    %c1_34 = arith.constant 1 : index
    %c0_35 = arith.constant 0 : index
    %c0_36 = arith.constant 0 : index
    %33 = vector.load %arg2[%c1_33, %c1_34, %c0_35, %c0_36] : memref<3x3x64x128xf32, #tpu.memory_space<vmem>>, vector<1x1x64x128xf32>
    %34 = vector.shape_cast %33 : vector<1x1x64x128xf32> to vector<64x128xf32>
    %cst_37 = arith.constant dense<0.000000e+00> : vector<16x128xf32>
    %35 = tpu.matmul %32, %34, %cst_37 {dimension_numbers = #tpu.dot_dimension_numbers<[1], [0], [0], [1], [0, 0, 1, 1], [], []>} : vector<16x64xf32>, vector<64x128xf32>, vector<16x128xf32> -> vector<16x128xf32>
    %36 = arith.addf %31, %35 : vector<16x128xf32>
    %37 = vector.extract_strided_slice %26 {offsets = [2, 0], sizes = [16, 64], strides = [1, 1]} : vector<18x64xf32> to vector<16x64xf32>
    %c2_38 = arith.constant 2 : index
    %c1_39 = arith.constant 1 : index
    %c0_40 = arith.constant 0 : index
    %c0_41 = arith.constant 0 : index
    %38 = vector.load %arg2[%c2_38, %c1_39, %c0_40, %c0_41] : memref<3x3x64x128xf32, #tpu.memory_space<vmem>>, vector<1x1x64x128xf32>
    %39 = vector.shape_cast %38 : vector<1x1x64x128xf32> to vector<64x128xf32>
    %cst_42 = arith.constant dense<0.000000e+00> : vector<16x128xf32>
    %40 = tpu.matmul %37, %39, %cst_42 {dimension_numbers = #tpu.dot_dimension_numbers<[1], [0], [0], [1], [0, 0, 1, 1], [], []>} : vector<16x64xf32>, vector<64x128xf32>, vector<16x128xf32> -> vector<16x128xf32>
    %41 = arith.addf %36, %40 : vector<16x128xf32>
    %c0_43 = arith.constant 0 : index
    %c8 = arith.constant 8 : index
    %42 = vector.load %arg7[%c0_43, %c8] : memref<18x72xf32, #tpu.memory_space<vmem>>, vector<18x64xf32>
    %43 = vector.extract_strided_slice %42 {offsets = [0, 0], sizes = [16, 64], strides = [1, 1]} : vector<18x64xf32> to vector<16x64xf32>
    %c0_44 = arith.constant 0 : index
    %c2_45 = arith.constant 2 : index
    %c0_46 = arith.constant 0 : index
    %c0_47 = arith.constant 0 : index
    %44 = vector.load %arg2[%c0_44, %c2_45, %c0_46, %c0_47] : memref<3x3x64x128xf32, #tpu.memory_space<vmem>>, vector<1x1x64x128xf32>
    %45 = vector.shape_cast %44 : vector<1x1x64x128xf32> to vector<64x128xf32>
    %cst_48 = arith.constant dense<0.000000e+00> : vector<16x128xf32>
    %46 = tpu.matmul %43, %45, %cst_48 {dimension_numbers = #tpu.dot_dimension_numbers<[1], [0], [0], [1], [0, 0, 1, 1], [], []>} : vector<16x64xf32>, vector<64x128xf32>, vector<16x128xf32> -> vector<16x128xf32>
    %47 = arith.addf %41, %46 : vector<16x128xf32>
    %48 = vector.extract_strided_slice %42 {offsets = [1, 0], sizes = [16, 64], strides = [1, 1]} : vector<18x64xf32> to vector<16x64xf32>
    %c1_49 = arith.constant 1 : index
    %c2_50 = arith.constant 2 : index
    %c0_51 = arith.constant 0 : index
    %c0_52 = arith.constant 0 : index
    %49 = vector.load %arg2[%c1_49, %c2_50, %c0_51, %c0_52] : memref<3x3x64x128xf32, #tpu.memory_space<vmem>>, vector<1x1x64x128xf32>
    %50 = vector.shape_cast %49 : vector<1x1x64x128xf32> to vector<64x128xf32>
    %cst_53 = arith.constant dense<0.000000e+00> : vector<16x128xf32>
    %51 = tpu.matmul %48, %50, %cst_53 {dimension_numbers = #tpu.dot_dimension_numbers<[1], [0], [0], [1], [0, 0, 1, 1], [], []>} : vector<16x64xf32>, vector<64x128xf32>, vector<16x128xf32> -> vector<16x128xf32>
    %52 = arith.addf %47, %51 : vector<16x128xf32>
    %53 = vector.extract_strided_slice %42 {offsets = [2, 0], sizes = [16, 64], strides = [1, 1]} : vector<18x64xf32> to vector<16x64xf32>
    %c2_54 = arith.constant 2 : index
    %c2_55 = arith.constant 2 : index
    %c0_56 = arith.constant 0 : index
    %c0_57 = arith.constant 0 : index
    %54 = vector.load %arg2[%c2_54, %c2_55, %c0_56, %c0_57] : memref<3x3x64x128xf32, #tpu.memory_space<vmem>>, vector<1x1x64x128xf32>
    %55 = vector.shape_cast %54 : vector<1x1x64x128xf32> to vector<64x128xf32>
    %cst_58 = arith.constant dense<0.000000e+00> : vector<16x128xf32>
    %56 = tpu.matmul %53, %55, %cst_58 {dimension_numbers = #tpu.dot_dimension_numbers<[1], [0], [0], [1], [0, 0, 1, 1], [], []>} : vector<16x64xf32>, vector<64x128xf32>, vector<16x128xf32> -> vector<16x128xf32>
    %57 = arith.addf %52, %56 : vector<16x128xf32>
    %c0_59 = arith.constant 0 : index
    %c0_60 = arith.constant 0 : index
    %58 = vector.load %arg3[%c0_59, %c0_60] : memref<1x128xf32, #tpu.memory_space<vmem>>, vector<1x128xf32>
    %59 = vector.broadcast %58 : vector<1x128xf32> to vector<16x128xf32>
    %60 = arith.addf %57, %59 : vector<16x128xf32>
    %cst_61 = arith.constant 0.000000e+00 : f32
    %61 = vector.broadcast %cst_61 : f32 to vector<16x128xf32>
    %62 = arith.maximumf %60, %61 : vector<16x128xf32>
    %cst_62 = arith.constant 0.000000e+00 : f32
    %63 = vector.broadcast %cst_62 : f32 to vector<1x144xf32>
    %c0_63 = arith.constant 0 : index
    %c0_64 = arith.constant 0 : index
    %64 = vector.load %arg8[%c0_63, %c0_64] : memref<18x144xf32, #tpu.memory_space<vmem>>, vector<1x144xf32>
    tpu.vector_store %arg8[%c0_63, %c0_64], %63 {strides = array<i32>} : memref<18x144xf32, #tpu.memory_space<vmem>>, vector<1x144xf32>,
    %c17_65 = arith.constant 17 : index
    %c0_66 = arith.constant 0 : index
    %65 = vector.load %arg8[%c17_65, %c0_66] : memref<18x144xf32, #tpu.memory_space<vmem>>, vector<1x144xf32>
    tpu.vector_store %arg8[%c17_65, %c0_66], %63 {strides = array<i32>} : memref<18x144xf32, #tpu.memory_space<vmem>>, vector<1x144xf32>,
    %cst_67 = arith.constant 0.000000e+00 : f32
    %66 = vector.broadcast %cst_67 : f32 to vector<16x8xf32>
    %c1_68 = arith.constant 1 : index
    %c0_69 = arith.constant 0 : index
    %67 = vector.load %arg8[%c1_68, %c0_69] : memref<18x144xf32, #tpu.memory_space<vmem>>, vector<16x8xf32>
    tpu.vector_store %arg8[%c1_68, %c0_69], %66 {strides = array<i32>} : memref<18x144xf32, #tpu.memory_space<vmem>>, vector<16x8xf32>,
    %c1_70 = arith.constant 1 : index
    %c136 = arith.constant 136 : index
    %68 = vector.load %arg8[%c1_70, %c136] : memref<18x144xf32, #tpu.memory_space<vmem>>, vector<16x8xf32>
    tpu.vector_store %arg8[%c1_70, %c136], %66 {strides = array<i32>} : memref<18x144xf32, #tpu.memory_space<vmem>>, vector<16x8xf32>,
    %c1_71 = arith.constant 1 : index
    %c8_72 = arith.constant 8 : index
    %69 = vector.load %arg8[%c1_71, %c8_72] : memref<18x144xf32, #tpu.memory_space<vmem>>, vector<16x128xf32>
    tpu.vector_store %arg8[%c1_71, %c8_72], %62 {strides = array<i32>} : memref<18x144xf32, #tpu.memory_space<vmem>>, vector<16x128xf32>,
    %cst_73 = arith.constant 0.000000e+00 : f32
    %70 = vector.broadcast %cst_73 : f32 to vector<16x128xf32>
    %c0_74 = arith.constant 0 : index
    %c0_75 = arith.constant 0 : index
    %71 = vector.load %arg8[%c0_74, %c0_75] : memref<18x144xf32, #tpu.memory_space<vmem>>, vector<18x128xf32>
    %72 = vector.extract_strided_slice %71 {offsets = [0, 0], sizes = [16, 128], strides = [1, 1]} : vector<18x128xf32> to vector<16x128xf32>
    %c0_76 = arith.constant 0 : index
    %c0_77 = arith.constant 0 : index
    %c0_78 = arith.constant 0 : index
    %c0_79 = arith.constant 0 : index
    %73 = vector.load %arg4[%c0_76, %c0_77, %c0_78, %c0_79] : memref<3x3x128x128xf32, #tpu.memory_space<vmem>>, vector<1x1x128x128xf32>
    %74 = vector.shape_cast %73 : vector<1x1x128x128xf32> to vector<128x128xf32>
    %cst_80 = arith.constant dense<0.000000e+00> : vector<16x128xf32>
    %75 = tpu.matmul %72, %74, %cst_80 {dimension_numbers = #tpu.dot_dimension_numbers<[1], [0], [0], [1], [0, 0, 1, 1], [], []>} : vector<16x128xf32>, vector<128x128xf32>, vector<16x128xf32> -> vector<16x128xf32>
    %76 = arith.addf %70, %75 : vector<16x128xf32>
    %77 = vector.extract_strided_slice %71 {offsets = [1, 0], sizes = [16, 128], strides = [1, 1]} : vector<18x128xf32> to vector<16x128xf32>
    %c1_81 = arith.constant 1 : index
    %c0_82 = arith.constant 0 : index
    %c0_83 = arith.constant 0 : index
    %c0_84 = arith.constant 0 : index
    %78 = vector.load %arg4[%c1_81, %c0_82, %c0_83, %c0_84] : memref<3x3x128x128xf32, #tpu.memory_space<vmem>>, vector<1x1x128x128xf32>
    %79 = vector.shape_cast %78 : vector<1x1x128x128xf32> to vector<128x128xf32>
    %cst_85 = arith.constant dense<0.000000e+00> : vector<16x128xf32>
    %80 = tpu.matmul %77, %79, %cst_85 {dimension_numbers = #tpu.dot_dimension_numbers<[1], [0], [0], [1], [0, 0, 1, 1], [], []>} : vector<16x128xf32>, vector<128x128xf32>, vector<16x128xf32> -> vector<16x128xf32>
    %81 = arith.addf %76, %80 : vector<16x128xf32>
    %82 = vector.extract_strided_slice %71 {offsets = [2, 0], sizes = [16, 128], strides = [1, 1]} : vector<18x128xf32> to vector<16x128xf32>
    %c2_86 = arith.constant 2 : index
    %c0_87 = arith.constant 0 : index
    %c0_88 = arith.constant 0 : index
    %c0_89 = arith.constant 0 : index
    %83 = vector.load %arg4[%c2_86, %c0_87, %c0_88, %c0_89] : memref<3x3x128x128xf32, #tpu.memory_space<vmem>>, vector<1x1x128x128xf32>
    %84 = vector.shape_cast %83 : vector<1x1x128x128xf32> to vector<128x128xf32>
    %cst_90 = arith.constant dense<0.000000e+00> : vector<16x128xf32>
    %85 = tpu.matmul %82, %84, %cst_90 {dimension_numbers = #tpu.dot_dimension_numbers<[1], [0], [0], [1], [0, 0, 1, 1], [], []>} : vector<16x128xf32>, vector<128x128xf32>, vector<16x128xf32> -> vector<16x128xf32>
    %86 = arith.addf %81, %85 : vector<16x128xf32>
    %c0_91 = arith.constant 0 : index
    %c8_92 = arith.constant 8 : index
    %87 = vector.load %arg8[%c0_91, %c8_92] : memref<18x144xf32, #tpu.memory_space<vmem>>, vector<18x128xf32>
    %88 = vector.extract_strided_slice %87 {offsets = [0, 0], sizes = [16, 128], strides = [1, 1]} : vector<18x128xf32> to vector<16x128xf32>
    %c0_93 = arith.constant 0 : index
    %c1_94 = arith.constant 1 : index
    %c0_95 = arith.constant 0 : index
    %c0_96 = arith.constant 0 : index
    %89 = vector.load %arg4[%c0_93, %c1_94, %c0_95, %c0_96] : memref<3x3x128x128xf32, #tpu.memory_space<vmem>>, vector<1x1x128x128xf32>
    %90 = vector.shape_cast %89 : vector<1x1x128x128xf32> to vector<128x128xf32>
    %cst_97 = arith.constant dense<0.000000e+00> : vector<16x128xf32>
    %91 = tpu.matmul %88, %90, %cst_97 {dimension_numbers = #tpu.dot_dimension_numbers<[1], [0], [0], [1], [0, 0, 1, 1], [], []>} : vector<16x128xf32>, vector<128x128xf32>, vector<16x128xf32> -> vector<16x128xf32>
    %92 = arith.addf %86, %91 : vector<16x128xf32>
    %93 = vector.extract_strided_slice %87 {offsets = [1, 0], sizes = [16, 128], strides = [1, 1]} : vector<18x128xf32> to vector<16x128xf32>
    %c1_98 = arith.constant 1 : index
    %c1_99 = arith.constant 1 : index
    %c0_100 = arith.constant 0 : index
    %c0_101 = arith.constant 0 : index
    %94 = vector.load %arg4[%c1_98, %c1_99, %c0_100, %c0_101] : memref<3x3x128x128xf32, #tpu.memory_space<vmem>>, vector<1x1x128x128xf32>
    %95 = vector.shape_cast %94 : vector<1x1x128x128xf32> to vector<128x128xf32>
    %cst_102 = arith.constant dense<0.000000e+00> : vector<16x128xf32>
    %96 = tpu.matmul %93, %95, %cst_102 {dimension_numbers = #tpu.dot_dimension_numbers<[1], [0], [0], [1], [0, 0, 1, 1], [], []>} : vector<16x128xf32>, vector<128x128xf32>, vector<16x128xf32> -> vector<16x128xf32>
    %97 = arith.addf %92, %96 : vector<16x128xf32>
    %98 = vector.extract_strided_slice %87 {offsets = [2, 0], sizes = [16, 128], strides = [1, 1]} : vector<18x128xf32> to vector<16x128xf32>
    %c2_103 = arith.constant 2 : index
    %c1_104 = arith.constant 1 : index
    %c0_105 = arith.constant 0 : index
    %c0_106 = arith.constant 0 : index
    %99 = vector.load %arg4[%c2_103, %c1_104, %c0_105, %c0_106] : memref<3x3x128x128xf32, #tpu.memory_space<vmem>>, vector<1x1x128x128xf32>
    %100 = vector.shape_cast %99 : vector<1x1x128x128xf32> to vector<128x128xf32>
    %cst_107 = arith.constant dense<0.000000e+00> : vector<16x128xf32>
    %101 = tpu.matmul %98, %100, %cst_107 {dimension_numbers = #tpu.dot_dimension_numbers<[1], [0], [0], [1], [0, 0, 1, 1], [], []>} : vector<16x128xf32>, vector<128x128xf32>, vector<16x128xf32> -> vector<16x128xf32>
    %102 = arith.addf %97, %101 : vector<16x128xf32>
    %c0_108 = arith.constant 0 : index
    %c16 = arith.constant 16 : index
    %103 = vector.load %arg8[%c0_108, %c16] : memref<18x144xf32, #tpu.memory_space<vmem>>, vector<18x128xf32>
    %104 = vector.extract_strided_slice %103 {offsets = [0, 0], sizes = [16, 128], strides = [1, 1]} : vector<18x128xf32> to vector<16x128xf32>
    %c0_109 = arith.constant 0 : index
    %c2_110 = arith.constant 2 : index
    %c0_111 = arith.constant 0 : index
    %c0_112 = arith.constant 0 : index
    %105 = vector.load %arg4[%c0_109, %c2_110, %c0_111, %c0_112] : memref<3x3x128x128xf32, #tpu.memory_space<vmem>>, vector<1x1x128x128xf32>
    %106 = vector.shape_cast %105 : vector<1x1x128x128xf32> to vector<128x128xf32>
    %cst_113 = arith.constant dense<0.000000e+00> : vector<16x128xf32>
    %107 = tpu.matmul %104, %106, %cst_113 {dimension_numbers = #tpu.dot_dimension_numbers<[1], [0], [0], [1], [0, 0, 1, 1], [], []>} : vector<16x128xf32>, vector<128x128xf32>, vector<16x128xf32> -> vector<16x128xf32>
    %108 = arith.addf %102, %107 : vector<16x128xf32>
    %109 = vector.extract_strided_slice %103 {offsets = [1, 0], sizes = [16, 128], strides = [1, 1]} : vector<18x128xf32> to vector<16x128xf32>
    %c1_114 = arith.constant 1 : index
    %c2_115 = arith.constant 2 : index
    %c0_116 = arith.constant 0 : index
    %c0_117 = arith.constant 0 : index
    %110 = vector.load %arg4[%c1_114, %c2_115, %c0_116, %c0_117] : memref<3x3x128x128xf32, #tpu.memory_space<vmem>>, vector<1x1x128x128xf32>
    %111 = vector.shape_cast %110 : vector<1x1x128x128xf32> to vector<128x128xf32>
    %cst_118 = arith.constant dense<0.000000e+00> : vector<16x128xf32>
    %112 = tpu.matmul %109, %111, %cst_118 {dimension_numbers = #tpu.dot_dimension_numbers<[1], [0], [0], [1], [0, 0, 1, 1], [], []>} : vector<16x128xf32>, vector<128x128xf32>, vector<16x128xf32> -> vector<16x128xf32>
    %113 = arith.addf %108, %112 : vector<16x128xf32>
    %114 = vector.extract_strided_slice %103 {offsets = [2, 0], sizes = [16, 128], strides = [1, 1]} : vector<18x128xf32> to vector<16x128xf32>
    %c2_119 = arith.constant 2 : index
    %c2_120 = arith.constant 2 : index
    %c0_121 = arith.constant 0 : index
    %c0_122 = arith.constant 0 : index
    %115 = vector.load %arg4[%c2_119, %c2_120, %c0_121, %c0_122] : memref<3x3x128x128xf32, #tpu.memory_space<vmem>>, vector<1x1x128x128xf32>
    %116 = vector.shape_cast %115 : vector<1x1x128x128xf32> to vector<128x128xf32>
    %cst_123 = arith.constant dense<0.000000e+00> : vector<16x128xf32>
    %117 = tpu.matmul %114, %116, %cst_123 {dimension_numbers = #tpu.dot_dimension_numbers<[1], [0], [0], [1], [0, 0, 1, 1], [], []>} : vector<16x128xf32>, vector<128x128xf32>, vector<16x128xf32> -> vector<16x128xf32>
    %118 = arith.addf %113, %117 : vector<16x128xf32>
    %c0_124 = arith.constant 0 : index
    %c0_125 = arith.constant 0 : index
    %119 = vector.load %arg5[%c0_124, %c0_125] : memref<1x128xf32, #tpu.memory_space<vmem>>, vector<1x128xf32>
    %120 = vector.broadcast %119 : vector<1x128xf32> to vector<16x128xf32>
    %121 = arith.addf %118, %120 : vector<16x128xf32>
    %cst_126 = arith.constant 0.000000e+00 : f32
    %122 = vector.broadcast %cst_126 : f32 to vector<16x128xf32>
    %123 = arith.maximumf %121, %122 : vector<16x128xf32>
    %124 = vector.shape_cast %123 : vector<16x128xf32> to vector<1x16x128xf32>
    %c0_127 = arith.constant 0 : index
    %c0_128 = arith.constant 0 : index
    %c0_129 = arith.constant 0 : index
    %125 = vector.load %arg6[%c0_127, %c0_128, %c0_129] : memref<1x16x128xf32, #tpu.memory_space<vmem>>, vector<1x16x128xf32>
    tpu.vector_store %arg6[%c0_127, %c0_128, %c0_129], %124 {strides = array<i32>} : memref<1x16x128xf32, #tpu.memory_space<vmem>>, vector<1x16x128xf32>,
    return
  }
  func.func @transform_0(%arg0: i32) -> (i32, i32, i32) {
    %c0_i32 = arith.constant 0 : i32
    %c0_i32_0 = arith.constant 0 : i32
    %c0_i32_1 = arith.constant 0 : i32
    return %arg0, %c0_i32, %c0_i32_0 : i32, i32, i32
  }
  func.func @transform_1(%arg0: i32) -> (i32, i32, i32, i32) {
    %c0_i32 = arith.constant 0 : i32
    %c0_i32_0 = arith.constant 0 : i32
    %c0_i32_1 = arith.constant 0 : i32
    %c0_i32_2 = arith.constant 0 : i32
    %c0_i32_3 = arith.constant 0 : i32
    return %c0_i32, %c0_i32_0, %c0_i32_1, %c0_i32_2 : i32, i32, i32, i32
  }
  func.func @transform_2(%arg0: i32) -> (i32, i32) {
    %c0_i32 = arith.constant 0 : i32
    %c0_i32_0 = arith.constant 0 : i32
    %c0_i32_1 = arith.constant 0 : i32
    return %c0_i32, %c0_i32_0 : i32, i32
  }
  func.func @transform_3(%arg0: i32) -> (i32, i32, i32, i32) {
    %c0_i32 = arith.constant 0 : i32
    %c0_i32_0 = arith.constant 0 : i32
    %c0_i32_1 = arith.constant 0 : i32
    %c0_i32_2 = arith.constant 0 : i32
    %c0_i32_3 = arith.constant 0 : i32
    return %c0_i32, %c0_i32_0, %c0_i32_1, %c0_i32_2 : i32, i32, i32, i32
  }
  func.func @transform_4(%arg0: i32) -> (i32, i32) {
    %c0_i32 = arith.constant 0 : i32
    %c0_i32_0 = arith.constant 0 : i32
    %c0_i32_1 = arith.constant 0 : i32
    return %c0_i32, %c0_i32_0 : i32, i32
  }
  func.func @transform_5(%arg0: i32) -> (i32, i32, i32) {
    %c0_i32 = arith.constant 0 : i32
    %c0_i32_0 = arith.constant 0 : i32
    %c0_i32_1 = arith.constant 0 : i32
    return %arg0, %c0_i32, %c0_i32_0 : i32, i32, i32
  }
}

</mosaic_0001>

<bundles_post_ra>
// kernel: tpu_custom_call.1
= control target key start
LH: loop header
LB: loop body
LE: loop exit
PB: predicated region body
PF: predicated region fallthrough
CT: control target
= control target key end

     0   :  { %10 = vsyncpa [#allocation5], 0  ;;  %s4230_s0 = inlined_call_operand.hbm [shape: f32[2,16,64], index: 0, kind: input, shape index: {}]   ;;  %s4231_s1 = inlined_call_operand.hbm [shape: f32[3,3,64,128], index: 1, kind: input, shape index: {}]   ;;  %s4232_s2 = inlined_call_operand.vmem [shape: f32[1,128], index: 2, kind: input, shape index: {}]   ;;  %s4233_s3 = inlined_call_operand.hbm [shape: f32[3,3,128,128], index: 3, kind: input, shape index: {}]   ;;  %s4234_s4 = inlined_call_operand.vmem [shape: f32[1,128], index: 4, kind: input, shape index: {}]   ;;  %s4235_s5 = inlined_call_operand.hbm [shape: f32[2,16,128], index: 5, kind: output, shape index: {}]  }
   0x1   :  { %12 = vsyncpa [#allocation5 + $0x1], 0 }
   0x2   :  { %13 = vsyncpa [#allocation8], 0 }
   0x3   :  { %14 = vsyncpa [#allocation6], 0 }
   0x4   :  { %16 = vsyncpa [#allocation6 + $0x1], 0  ;;  %s3863_s18 = smov 0   ;;  %s3865_s19 = smov 0  }
   0x5   :  { %s3867_s20 = smov 0   ;;  %s3869_s21 = smov 0  }
   0x6 LB: > { %s3884_s22 = sadd.s32 4294967295, %s3818_s21   ;;  %s2284_s23 = sadd.s32 4294967294, %s3818_s21   ;;  %s3818_s21 = sphi %s3869_s21, %s4255_s21   ;;  %s3814_s20 = sphi %s3867_s20, %s4254_s20   ;;  %s3810_s19 = sphi %s3865_s19, %s4253_s19   ;;  %s3806_s18 = sphi %s3863_s18, %s4252_s18  }
   0x7   : > { %p42_p0 = scmp.ne.s32.totalorder %s3810_s19, %s3806_s18  ;;  %p4236_p1 = scmp.eq.s32.totalorder %s3884_s22, 0 }
   0x8   : > { %p156_p3 = scmp.eq.s32.totalorder %s2284_s23, 1  ;;  %p2285_p5 = scmp.ge.s32.totalorder %s3818_s21, 1 }
   0x9   : > { %p3893_p4 = por %p4236_p1, %p42_p0  ;;  %p163_p7 = scmp.lt.s32.totalorder %s3818_s21, 3 }
   0xa   : > { %p3898_p6 = por %p156_p3, %p42_p0  ;;  %s3820_s27 = smov [#allocation7]  }
   0xb   : > { %s4239_s24 = scalar_select %p3893_p4, 1, 0 }
   0xc   : > { %s4240_s25 = scalar_select %p3898_p6, 1, 0 }
   0xd   : > { %p3903_p8 = pnand %p2285_p5, %p163_p7  ;;  %s175_s28 = sshll.u32 %s3820_s27, 4  ;;  %s3907_s28 = int_to_ptr.vmem [resolvable:$true] %s175_s28 }
   0xe   : > { %s3821_s30 = smov [#allocation9]   ;;  %s3662_s9 = scalar_lea.hbm %s4231_s1, 9216 }
   0xf   : > { %p3538_p9 = pneg %p3903_p8  ;;  %s191_s6 = sshll.u32 %s3821_s30, 4  ;;  %s3918_s6 = int_to_ptr.vmem [resolvable:$true] %s191_s6 }
  0x10   : > { %p3663_p12 = scmp.ne.s32.totalorder %s4231_s1, %s3662_s9  ;;  %p3669_p5 = scmp.lt.u32.totalorder %s3662_s9, %s4231_s1 }
  0x11   : > { %p3914_p11 = pnand %p3538_p9, %p4236_p1 }
  0x13   : > { %p3664_p13 = pneg %p3914_p11 }
  0x15   : > { %p3665_p0 = pnand %p3664_p13, %p3663_p12 }
  0x17   : > { %p3666_p3 = pneg %p3665_p0 }
  0x19   : > { %p3671_p7 = pnand %p3669_p5, %p3666_p3 }
  0x1b   : > { %3674 = shalt.err (!%p3671_p7)
}
  0x1c   : > { %s3675_s14 = scalar_lea.vmem %s3907_s28, 9216  ;;  %p3683_p2 = scmp.lt.s32.totalorder %s3907_s28, %s3907_s28 }
  0x1d   : > { %p3676_p9 = scmp.ne.s32.totalorder %s3907_s28, %s3675_s14  ;;  %p3684_p12 = scmp.lt.s32.totalorder %s3675_s14, %s3675_s14 }
  0x1f   : > { %p3678_p10 = pnand %p3676_p9, %p3664_p13  ;;  %p3685_p0 = por %p3684_p12, %p3683_p2 }
  0x21   : > { %p3679_p1 = pneg %p3678_p10 }
  0x23   : > { %p3686_p6 = pnand %p3685_p0, %p3679_p1 }
  0x25   : > { %3689 = shalt.err (!%p3686_p6)
}
  0x26   : > { %s3822_s15 = smov 128   ;;  %s3823_s16 = smov 8  }
  0x27   : > { %3541 = dma.hbm_to_vmem [thread:$0]  (!%p3914_p11), %s4231_s1, 9216, %s3907_s28, [#allocation8], %s3822_s15, %s3822_s15, %s3823_s16  }
  0x28   : > { %s3690_s7 = scalar_lea.hbm %s4233_s3, 18432 }
  0x29   : > { %p3691_p1 = scmp.ne.s32.totalorder %s4233_s3, %s3690_s7  ;;  %p3697_p10 = scmp.lt.u32.totalorder %s3690_s7, %s4233_s3 }
  0x2b   : > { %p3693_p2 = pnand %p3691_p1, %p3664_p13 }
  0x2d   : > { %p3694_p6 = pneg %p3693_p2 }
  0x2f   : > { %p3699_p3 = pnand %p3697_p10, %p3694_p6 }
  0x31   : > { %3702 = shalt.err (!%p3699_p3)
}
  0x32   : > { %s3703_s28 = scalar_lea.vmem %s3918_s6, 18432  ;;  %p3711_p12 = scmp.lt.s32.totalorder %s3918_s6, %s3918_s6 }
  0x33   : > { %p3704_p5 = scmp.ne.s32.totalorder %s3918_s6, %s3703_s28  ;;  %p3712_p0 = scmp.lt.s32.totalorder %s3703_s28, %s3703_s28 }
  0x35   : > { %p3706_p7 = pnand %p3704_p5, %p3664_p13  ;;  %p3713_p1 = por %p3712_p0, %p3711_p12 }
  0x37   : > { %p3707_p9 = pneg %p3706_p7 }
  0x39   : > { %p3714_p2 = pnand %p3713_p1, %p3707_p9 }
  0x3b   : > { %3717 = shalt.err (!%p3714_p2)
}
  0x3c   : > { %3544 = dma.hbm_to_vmem [thread:$0]  (!%p3914_p11), %s4233_s3, 18432, %s3918_s6, [#allocation8], %s3822_s15, %s3822_s15, %s3823_s16  }
  0x3d   : > { %s3979_s29 = sadd.s32 1, %s3818_s21   ;;  %s29_s14 = sadd.s32 1, %s3814_s20 }
  0x3e   : > { %s26_s17 = ssub.s32 %s3818_s21, %s3979_s29  ;;  %p36_p13 = scmp.ne.s32.totalorder %s3814_s20, %s3810_s19 }
  0x3f   : > { %p27_p6 = scmp.eq.s32.totalorder %s26_s17, 0  ;;  %p37_p10 = scmp.eq.s32.totalorder %s3818_s21, 0 }
  0x40   : > { %p4243_p3 = scmp.eq.s32.totalorder %s3884_s22, 1  ;;  %p3555_p7 = scmp.lt.s32.totalorder %s3818_s21, 2 }
  0x41   : > { %s3995_s27 = scalar_select %p27_p6, %s3814_s20, %s29_s14  }
  0x42   : > { %p3989_p5 = por %p4243_p3, %p36_p13  ;;  %p38_p9 = por %p37_p10, %p36_p13 }
  0x43   : > { %s208_s30 = sand.u32 1, %s3814_s20   ;;  %s2322_s6 = sshll.u32 %s3818_s21, 8 }
  0x44   : > { %s4244_s23 = scalar_select %p3989_p5, 1, 0 }
  0x45   : > { %s2289_s7 = sshll.u32 %s208_s30, 4  ;;  %s4002_s10 = scalar_lea.hbm %s4230_s0, %s2322_s6 }
  0x46   : > { %s212_s11 = scalar_lea.vmem [#allocation4], %s2289_s7  ;;  %p4006_p11 = pnand %p3555_p7, %p38_p9 }
  0x47   : > { %s219_s28 = sshll.u32 %s212_s11, 4  ;;  %s4010_s13 = scalar_lea.sflag [#allocation5], %s208_s30  ;;  %s4004_s28 = int_to_ptr.vmem [resolvable:$true] %s219_s28 }
  0x48   : > { %s3718_s14 = scalar_lea.hbm %s4002_s10, 256  ;;  %p3720_p0 = pneg %p4006_p11 }
  0x49   : > { %p3719_p12 = scmp.ne.s32.totalorder %s4002_s10, %s3718_s14  ;;  %s3723_s6 = scalar_lea.hbm %s4230_s0, 512 }
  0x4a   : > { %p3724_p13 = scmp.lt.u32.totalorder %s4002_s10, %s4230_s0  ;;  %p3725_p6 = scmp.lt.u32.totalorder %s3723_s6, %s3718_s14 }
  0x4b   : > { %p3721_p1 = pnand %p3720_p0, %p3719_p12  ;;  %p3727_p3 = scmp.lt.u32.totalorder %s3718_s14, %s4002_s10 }
  0x4c   : > { %p3726_p10 = por %p3725_p6, %p3724_p13 }
  0x4d   : > { %p3722_p2 = pneg %p3721_p1 }
  0x4e   : > { %p3728_p7 = por %p3727_p3, %p3726_p10 }
  0x50   : > { %p3729_p9 = pnand %p3728_p7, %p3722_p2 }
  0x52   : > { %3732 = shalt.err (!%p3729_p9)
}
  0x53   : > { %s3733_s30 = scalar_lea.vmem %s4004_s28, 256  ;;  %s3824_s11 = smov [#allocation4]  }
  0x54   : > { %p3734_p12 = scmp.ne.s32.totalorder %s4004_s28, %s3733_s30  ;;  %s3738_s17 = sshll.u32 %s3824_s11, 4  ;;  %s3739_s17 = int_to_ptr.vmem [resolvable:$false] %s3738_s17 }
  0x55   : > { %s3740_s7 = scalar_lea.vmem %s3739_s17, 512  ;;  %p3741_p4 = scmp.lt.s32.totalorder %s4004_s28, %s3739_s17 }
  0x56   : > { %p3736_p1 = pnand %p3734_p12, %p3720_p0  ;;  %p3742_p13 = scmp.lt.s32.totalorder %s3740_s7, %s3733_s30 }
  0x58   : > { %p3737_p5 = pneg %p3736_p1  ;;  %p3743_p6 = por %p3742_p13, %p3741_p4 }
  0x5a   : > { %p3744_p10 = pnand %p3743_p6, %p3737_p5 }
  0x5c   : > { %3747 = shalt.err (!%p3744_p10)
}
  0x5d   : > { %3548 = dma.hbm_to_vmem [thread:$0]  (!%p4006_p11), %s4002_s10, 256, %s4004_s28, %s4010_s13, %s3822_s15, %s3822_s15, %s3823_s16  }
  0x5e   : > { %231 = sbr.rel (%p3903_p8) target bundleno = 1287 (0x507), region = 40  ;;  %s4044_s14 = sand.u32 (!%p3903_p8), 1, %s3810_s19  }
  0x5f   : > { %s2293_s6 = sshll.u32 (!%p3903_p8), %s4044_s14, 4  ;;  %s234_s8 = scalar_lea.sflag (!%p3903_p8), [#allocation5], %s4044_s14 }
  0x60   : > { %s237_s12 = scalar_lea.vmem (!%p3903_p8), [#allocation4], %s2293_s6  ;;  %p4246_p4 = scmp.ne.s32.totalorder (!%p3903_p8), %s4239_s24, 0 }
  0x65   : > { %3793 = dma.done.wait (%p4246_p4), %s234_s8, 256  }
  0x66   : > { %3795 = vsyncadd (%p4246_p4), %s234_s8, 4294967040  ;;  %p4247_p5 = scmp.eq.s32.totalorder %s3884_s22, 0 }
  0x68   : > { %3797 = dma.done.wait (%p4247_p5), [#allocation8], 27648   ;;  %p4248_p8 = pmov %p4247_p5 }
  0x69   : > { %vm277_vm0 = vcmask 31744   ;;  %vm280_vm1 = vcmask 589344   ;;  %v3825_v0 = vmov 0.0   ;;  %vm274_vm2 = vcmask 581632   ;;  %v272_v1 = vld [vmem:[%s237_s12] sm:$0xff]  ;;  %s3826_s24 = smov 4  }
  0x6a   : > { %3799 = vsyncadd (%p4248_p8), [#allocation8], 4294939648  ;;  %278 = vst.msk [vmem:[#allocation2 + $0x1] sm:$0xff] %vm277_vm0, %v3825_v0  ;;  %v306_v2 = vld [vmem:[#allocation7 + $0xc0] sm:$0xff]  ;;  %285 = vrot.lane.b32.xlu0 %v272_v1, %s3826_s24  ;;  %v307_v3 = vld [vmem:[#allocation7 + $0xc8] sm:$0xff]  ;;  %vm291_vm3 = vcmask 556064  }
  0x6b   : > { %279 = vst.msk [vmem:[#allocation2 + $0x9] sm:$0xff] %vm277_vm0, %v3825_v0  ;;  %v308_v4 = vld [vmem:[#allocation7 + $0xd0] sm:$0xff]  ;;  %v309_v5 = vld [vmem:[#allocation7 + $0xd8] sm:$0xff]  ;;  %v3062_v7 = vpack.c.bf16 %v307_v3, %v306_v2  ;;  %v310_v9 = vld [vmem:[#allocation7 + $0xe0] sm:$0xff]  ;;  %s3827_s26 = smov 124   ;;  %vm317_vm4 = vcmask 1046528  }
  0x6c   : > { %281 = vst.msk [vmem:[#allocation2 + $0x1] sm:$0xff] %vm280_vm1, %v3825_v0  ;;  %282 = vst.msk [vmem:[#allocation2 + $0x9] sm:$0xff] %vm280_vm1, %v3825_v0  ;;  %v273_v6 = vld [vmem:[%s237_s12 + $0x8] sm:$0xff]  ;;  %v3066_v8 = vpack.c.bf16 %v309_v5, %v308_v4  ;;  %v312_v12 = vld [vmem:[#allocation7 + $0xf0] sm:$0xff]  ;;  %vm323_vm5 = vcmask 523264   ;;  %vm491_vm6 = vcmask 1045504  }
  0x6d   : > { %275 = vst.msk [vmem:[#allocation2] sm:$0x1] %vm274_vm2, %v3825_v0  ;;  %276 = vst.msk [vmem:[#allocation2 + $0x11] sm:$0x1] %vm274_vm2, %v3825_v0  ;;  %v311_v10 = vld [vmem:[#allocation7 + $0xe8] sm:$0xff]  ;;  %3063 = vmatprep.subr.bf16.mxu0 %v3062_v7  ;;  %v313_v13 = vld [vmem:[#allocation7 + $0xf8] sm:$0xff] }
  0x6e   : > { %287 = vrot.lane.b32.xlu0 %v273_v6, %s3826_s24  ;;  %3065 = vmatpush3.bf16.msra.mxu0 %v3062_v7  ;;  %v3070_v11 = vpack.c.bf16 %v311_v10, %v310_v9  ;;  %v3074_v14 = vpack.c.bf16 %v313_v13, %v312_v12  ;;  %v297_v15 = vld [vmem:[#allocation7] sm:$0xff]  ;;  %v298_v16 = vld [vmem:[#allocation7 + $0x8] sm:$0xff]  ;;  %v299_v21 = vld [vmem:[#allocation7 + $0x10] sm:$0xff]  ;;  %s3828_s15 = smov 120   ;;  %vm1162_vm7 = vcmask 64513   ;;  %vm1168_vm8 = vcmask 130113  }
  0x6f   : > { %3067 = vmatprep.subr.bf16.mxu0 %v3066_v8  ;;  %v3078_v17 = vpack.c.bf16 %v298_v16, %v297_v15  ;;  %v300_v24 = vld [vmem:[#allocation7 + $0x18] sm:$0xff]  ;;  %v301_v33 = vld [vmem:[#allocation7 + $0x20] sm:$0xff]  ;;  %v302_v34 = vld [vmem:[#allocation7 + $0x28] sm:$0xff]  ;;  %1163 = vst.msk [vmem:[#allocation3] sm:$0xfe] %vm1162_vm7, %v3825_v0  ;;  %vm1164_vm9 = vcmask 64512  }
  0x70   : > { %v3082_v31 = vpack.c.bf16 %v300_v24, %v299_v21  ;;  %v3086_v37 = vpack.c.bf16 %v302_v34, %v301_v33  ;;  %v303_v39 = vld [vmem:[#allocation7 + $0x30] sm:$0xff]  ;;  %v304_v40 = vld [vmem:[#allocation7 + $0x38] sm:$0xff]  ;;  %v483_v42 = vld [vmem:[#allocation7 + $0x180] sm:$0xff]  ;;  %1169 = vst.msk [vmem:[#allocation3 + $0x8] sm:$0xfe] %vm1168_vm8, %v3825_v0  ;;  %vm1170_vm10 = vcmask 130112  }
  0x71   : > { %v3090_v41 = vpack.c.bf16 %v304_v40, %v303_v39  ;;  %v484_v43 = vld [vmem:[#allocation7 + $0x188] sm:$0xff]  ;;  %v485_v45 = vld [vmem:[#allocation7 + $0x190] sm:$0xff]  ;;  %v486_v46 = vld [vmem:[#allocation7 + $0x198] sm:$0xff]  ;;  %1165 = vst.msk [vmem:[#allocation3 + $0x10] sm:$0xff] %vm1164_vm9, %v3825_v0  ;;  %vm1166_vm12 = vcmask 57344   ;;  %vm1172_vm13 = vcmask 122944  }
  0x72   : > { %3069 = vmatpush3.bf16.msra.mxu0 %v3066_v8  ;;  %v3094_v44 = vpack.c.bf16 %v484_v43, %v483_v42  ;;  %v3098_v47 = vpack.c.bf16 %v486_v46, %v485_v45  ;;  %v487_v48 = vld [vmem:[#allocation7 + $0x1a0] sm:$0xff]  ;;  %v488_v49 = vld [vmem:[#allocation7 + $0x1a8] sm:$0xff]  ;;  %v489_v51 = vld [vmem:[#allocation7 + $0x1b0] sm:$0xff]  ;;  %1171 = vst.msk [vmem:[#allocation3 + $0x18] sm:$0xff] %vm1170_vm10, %v3825_v0  ;;  %vm1176_vm14 = vcmask 1040384   ;;  %s3829_s28 = smov 8  }
  0x73   : > { %3071 = vmatprep.subr.bf16.mxu0 %v3070_v11  ;;  %v3102_v50 = vpack.c.bf16 %v488_v49, %v487_v48  ;;  %v490_v52 = vld [vmem:[#allocation7 + $0x1b8] sm:$0xff]  ;;  %v579_v54 = vld [vmem:[#allocation7 + $0x40] sm:$0xff]  ;;  %v580_v55 = vld [vmem:[#allocation7 + $0x48] sm:$0xff]  ;;  %1167 = vst.msk [vmem:[#allocation3 + $0x20] sm:$0x1] %vm1166_vm12, %v3825_v0  ;;  %vm1189_vm15 = vcmask 1047617  }
  0x74   : > { %v3106_v53 = vpack.c.bf16 %v490_v52, %v489_v51  ;;  %v3110_v56 = vpack.c.bf16 %v580_v55, %v579_v54  ;;  %v581_v57 = vld [vmem:[#allocation7 + $0x50] sm:$0xff]  ;;  %v582_v58 = vld [vmem:[#allocation7 + $0x58] sm:$0xff]  ;;  %v583_v60 = vld [vmem:[#allocation7 + $0x60] sm:$0xff]  ;;  %1173 = vst.msk [vmem:[#allocation3 + $0x28] sm:$0x1] %vm1172_vm13, %v3825_v0  ;;  %vm1192_vm0 = vcmask 1047616  }
  0x75   : > { %v3114_v59 = vpack.c.bf16 %v582_v58, %v581_v57  ;;  %v584_v61 = vld [vmem:[#allocation7 + $0x68] sm:$0xff]  ;;  %v585_v63 = vld [vmem:[#allocation7 + $0x70] sm:$0xff]  ;;  %v586_v1 = vld [vmem:[#allocation7 + $0x78] sm:$0xff]  ;;  %vm1195_vm1 = vcmask 1040448   ;;  %s3830_s13 = smov 112   ;;  %vm1530_vm2 = vcmask 982016  }
  0x76   : > { %3073 = vmatpush3.bf16.msra.mxu0 %v3070_v11  ;;  %v3118_v62 = vpack.c.bf16 %v584_v61, %v583_v60  ;;  %v3122_v2 = vpack.c.bf16 %v586_v1, %v585_v63  ;;  %v673_v3 = vld [vmem:[#allocation7 + $0x100] sm:$0xff]  ;;  %v674_v4 = vld [vmem:[#allocation7 + $0x108] sm:$0xff]  ;;  %v675_v7 = vld [vmem:[#allocation7 + $0x110] sm:$0xff]  ;;  %s271_s11 = scalar_lea.vmem [#allocation10], %s2293_s6  ;;  %s2323_s7 = sshll.u32 %s3884_s22, 8 }
  0x77   : > { %3075 = vmatprep.subr.bf16.mxu0 %v3074_v14  ;;  %v3126_v5 = vpack.c.bf16 %v674_v4, %v673_v3  ;;  %v676_v8 = vld [vmem:[#allocation7 + $0x118] sm:$0xff]  ;;  %v677_v11 = vld [vmem:[#allocation7 + $0x120] sm:$0xff]  ;;  %v678_v12 = vld [vmem:[#allocation7 + $0x128] sm:$0xff]  ;;  %s2192_s17 = sshll.u32 %s271_s11, 4  ;;  %s4185_s24 = scalar_lea.hbm %s4235_s5, %s2323_s7  ;;  %s4180_s17 = int_to_ptr.vmem [resolvable:$true] %s2192_s17 }
  0x78   : > { %v3130_v9 = vpack.c.bf16 %v676_v8, %v675_v7  ;;  %v679_v15 = vld [vmem:[#allocation7 + $0x130] sm:$0xff]  ;;  %v680_v16 = vld [vmem:[#allocation7 + $0x138] sm:$0xff]  ;;  %v862_v33 = vld [vmem:[#allocation7 + $0x88] sm:$0xff]  ;;  %s2179_s6 = scalar_lea.sflag [#allocation6], %s4044_s14  ;;  %p4249_p0 = scmp.ne.s32.totalorder %s4244_s23, 0 }
  0x79   : > { %v769_v21 = vld [vmem:[#allocation7 + $0x1d0] sm:$0xff]  ;;  %v865_v39 = vld [vmem:[#allocation7 + $0xa0] sm:$0xff]  ;;  %v866_v40 = vld [vmem:[#allocation7 + $0xa8] sm:$0xff]  ;;  %s3831_s22 = smov [#allocation10]  }
  0x7a   : > { %3077 = vmatpush3.bf16.msra.mxu0 %v3074_v14  ;;  %v3134_v14 = vpack.c.bf16 %v678_v12, %v677_v11  ;;  %v3166_v42 = vpack.c.bf16 %v866_v40, %v865_v39  ;;  %v867_v43 = vld [vmem:[#allocation7 + $0xb0] sm:$0xff]  ;;  %v955_v46 = vld [vmem:[#allocation7 + $0x140] sm:$0xff]  ;;  %v960_v54 = vld [vmem:[#allocation7 + $0x168] sm:$0xff] }
  0x7b   : > { %3079 = vmatprep.subr.bf16.mxu0 %v3078_v17  ;;  %v957_v49 = vld [vmem:[#allocation7 + $0x150] sm:$0xff]  ;;  %v962_v58 = vld [vmem:[#allocation7 + $0x178] sm:$0xff]  ;;  %v1049_v60 = vld [vmem:[#allocation7 + $0x200] sm:$0xff] }
  0x7c   : > { %v961_v57 = vld [vmem:[#allocation7 + $0x170] sm:$0xff]  ;;  %v1050_v61 = vld [vmem:[#allocation7 + $0x208] sm:$0xff]  ;;  %v1052_v1 = vld [vmem:[#allocation7 + $0x218] sm:$0xff] }
  0x7d   : > { %v1051_v63 = vld [vmem:[#allocation7 + $0x210] sm:$0xff]  ;;  %v1053_v4 = vld [vmem:[#allocation7 + $0x220] sm:$0xff]  ;;  %v1404_v39 = vld [vmem:[#allocation9 + $0x348] sm:$0xff] }
  0x7e   : > { %v1055_v8 = vld [vmem:[#allocation7 + $0x230] sm:$0xff]  ;;  %v1218_v12 = vld [vmem:[#allocation9 + $0x180] sm:$0xff] }
  0xdc   : > { %v286_v18 = vpop.permute.xlu0 %285 }
  0xdd   : > { %292 = vst.msk [vmem:[#allocation2 + $0x1] sm:$0xff] %vm291_vm3, %v286_v18  ;;  %v767_v18 = vld [vmem:[#allocation7 + $0x1c0] sm:$0xff] }
  0xe0   : > { %v288_v19 = vpop.permute.xlu0 %287 }
  0xe1   : > { %293 = vst.msk [vmem:[#allocation2 + $0x9] sm:$0xff] %vm291_vm3, %v288_v19  ;;  %v768_v19 = vld [vmem:[#allocation7 + $0x1c8] sm:$0xff]  ;;  %vm1871_vm3 = vcmask 916480  }
  0xe4   : > { %v294_v20 = vld [vmem:[#allocation2] sm:$0xff] }
  0xe5   : > { %587 = vrot.lane.b32.xlu1 %v294_v20, %s3827_s26  ;;  %v318_v25 = vrot.slane %v294_v20, 1  ;;  %v492_v35 = vrot.slane %v294_v20, 2 }
  0xe8   : > { %v295_v22 = vld [vmem:[#allocation2 + $0x8] sm:$0xff]  ;;  %v296_v23 = vld [vmem:[#allocation2 + $0x10] sm:$0x3] }
  0xe9   : > { %589 = vrot.lane.b32.xlu1 %v295_v22, %s3827_s26  ;;  %v319_v26 = vrot.slane %v295_v22, 1  ;;  %v321_v27 = vrot.slane %v296_v23, 1  ;;  %v493_v30 = vrot.slane %v295_v22, 2  ;;  %v495_v32 = vrot.slane %v296_v23, 2 }
  0xeb   : > { %v320_v28 = vsel %vm317_vm4, %v318_v25, %v319_v26  ;;  %v322_v29 = vsel %vm317_vm4, %v319_v26, %v321_v27  ;;  %v494_v36 = vsel %vm491_vm6, %v492_v35, %v493_v30  ;;  %v496_v38 = vsel %vm491_vm6, %v493_v30, %v495_v32  ;;  %v771_v25 = vld [vmem:[#allocation7 + $0x1e0] sm:$0xff]  ;;  %v772_v26 = vld [vmem:[#allocation7 + $0x1e8] sm:$0xff]  ;;  %v774_v30 = vld [vmem:[#allocation7 + $0x1f8] sm:$0xff] }
  0xec   : > { %681 = vrot.lane.b32.xlu0 %v320_v28, %s3827_s26  ;;  %2592 = vmatprep.mubr.msk.f32.mxu0 %vm323_vm5, %v320_v28  ;;  %v861_v32 = vld [vmem:[#allocation7 + $0x80] sm:$0xff]  ;;  %v863_v35 = vld [vmem:[#allocation7 + $0x90] sm:$0xff] }
  0xed   : > { %683 = vrot.lane.b32.xlu1 %v322_v29, %s3827_s26  ;;  %2593 = vmatmul.mubr.msk.f32.vlgmr.msra.gmra.mrb[0].mxu0 %vm323_vm5, %v322_v29  ;;  %v3158_v34 = vpack.c.bf16 %v862_v33, %v861_v32  ;;  %v1401_v32 = vld [vmem:[#allocation9 + $0x330] sm:$0xff]  ;;  %v1402_v33 = vld [vmem:[#allocation9 + $0x338] sm:$0xff] }
  0xee   : > { %3081 = vmatpush3.bf16.msra.mxu0 %v3078_v17  ;;  %2611 = vmatprep.mubr.msk.f32.mxu0 %vm323_vm5, %v294_v20  ;;  %v3138_v17 = vpack.c.bf16 %v680_v16, %v679_v15  ;;  %v1396_v16 = vld [vmem:[#allocation9 + $0x308] sm:$0xff] }
  0xef   : > { %3083 = vmatprep.subr.bf16.mxu0 %v3082_v31 }
  0xf0   : > { %775 = vrot.lane.b32.xlu0 %v494_v36, %s3827_s26 }
  0xf1   : > { %777 = vrot.lane.b32.xlu1 %v496_v38, %s3827_s26  ;;  %s3748_s26 = scalar_lea.vmem %s4180_s17, 256 }
  0xf2   : > { %3085 = vmatpush3.bf16.msra.mxu0 %v3082_v31  ;;  %p3749_p11 = scmp.ne.s32.totalorder %s4180_s17, %s3748_s26 }
  0xf3   : > { %3087 = vmatprep.subr.bf16.mxu0 %v3086_v37 }
  0xf4   : > { %869 = vrot.lane.b32.xlu0 %v294_v20, %s3828_s15  ;;  %v3142_v20 = vpack.c.bf16 %v768_v19, %v767_v18  ;;  %v1221_v18 = vld [vmem:[#allocation9 + $0x198] sm:$0xff]  ;;  %p3750_p2 = pnand %p3749_p11, %p4249_p0 }
  0xf5   : > { %871 = vrot.lane.b32.xlu1 %v295_v22, %s3828_s15 }
  0xf6   : > { %3089 = vmatpush3.bf16.msra.mxu0 %v3086_v37  ;;  %p3751_p3 = pneg %p3750_p2 }
  0xf7   : > { %3091 = vmatprep.subr.bf16.mxu0 %v3090_v41 }
  0xf8   : > { %963 = vrot.lane.b32.xlu0 %v320_v28, %s3828_s15  ;;  %v3150_v28 = vpack.c.bf16 %v772_v26, %v771_v25  ;;  %v1223_v25 = vld [vmem:[#allocation9 + $0x1a8] sm:$0xff]  ;;  %v1399_v26 = vld [vmem:[#allocation9 + $0x320] sm:$0xff] }
  0xf9   : > { %965 = vrot.lane.b32.xlu1 %v322_v29, %s3828_s15  ;;  %v773_v29 = vld [vmem:[#allocation7 + $0x1f0] sm:$0xff] }
  0xfa   : > { %3093 = vmatpush3.bf16.msra.mxu0 %v3090_v41  ;;  %v3154_v31 = vpack.c.bf16 %v774_v30, %v773_v29  ;;  %v1224_v30 = vld [vmem:[#allocation9 + $0x1b0] sm:$0xff] }
  0xfb   : > { %3095 = vmatprep.subr.bf16.mxu0 %v3094_v44 }
  0xfc   : > { %1057 = vrot.lane.b32.xlu0 %v494_v36, %s3828_s15 }
  0xfd   : > { %2612 = vmatmul.mubr.msk.f32.vlgmr.msra.gmra.mrb[0].mxu0 %vm323_vm5, %v295_v22  ;;  %1059 = vrot.lane.b32.xlu1 %v496_v38, %s3828_s15  ;;  %v770_v22 = vld [vmem:[#allocation7 + $0x1d8] sm:$0xff] }
  0xfe   : > { %3097 = vmatpush3.bf16.msra.mxu0 %v3094_v44  ;;  %2630 = vmatprep.mubr.msk.f32.mxu0 %vm323_vm5, %v494_v36  ;;  %v3146_v23 = vpack.c.bf16 %v770_v22, %v769_v21  ;;  %v864_v36 = vld [vmem:[#allocation7 + $0x98] sm:$0xff]  ;;  %v1397_v21 = vld [vmem:[#allocation9 + $0x310] sm:$0xff] }
  0xff   : > { %3099 = vmatprep.subr.bf16.mxu0 %v3098_v47  ;;  %v3162_v37 = vpack.c.bf16 %v864_v36, %v863_v35  ;;  %v868_v44 = vld [vmem:[#allocation7 + $0xb8] sm:$0xff]  ;;  %v3282_v35 = vpack.c.bf16 %v1402_v33, %v1401_v32  ;;  %v1226_v36 = vld [vmem:[#allocation9 + $0x1c0] sm:$0xff] }
 0x100   : > { %v3170_v45 = vpack.c.bf16 %v868_v44, %v867_v43  ;;  %v1398_v22 = vld [vmem:[#allocation9 + $0x318] sm:$0xff]  ;;  %v1228_v43 = vld [vmem:[#allocation9 + $0x1d0] sm:$0xff] }
 0x101   : > { %v1229_v44 = vld [vmem:[#allocation9 + $0x1d8] sm:$0xff] }
 0x102   : > { %3101 = vmatpush3.bf16.msra.mxu0 %v3098_v47  ;;  %v956_v47 = vld [vmem:[#allocation7 + $0x148] sm:$0xff] }
 0x103   : > { %3103 = vmatprep.subr.bf16.mxu0 %v3102_v50  ;;  %v3174_v48 = vpack.c.bf16 %v956_v47, %v955_v46  ;;  %v1405_v46 = vld [vmem:[#allocation9 + $0x350] sm:$0xff]  ;;  %v1406_v47 = vld [vmem:[#allocation9 + $0x358] sm:$0xff] }
 0x106   : > { %3105 = vmatpush3.bf16.msra.mxu0 %v3102_v50  ;;  %v958_v50 = vld [vmem:[#allocation7 + $0x158] sm:$0xff] }
 0x107   : > { %3107 = vmatprep.subr.bf16.mxu0 %v3106_v53  ;;  %v3178_v51 = vpack.c.bf16 %v958_v50, %v957_v49  ;;  %v2315_v49 = vld [vmem:[%s4232_s2] ss:$0 sm:$0xff]  ;;  %v1230_v50 = vld [vmem:[#allocation9 + $0x1e0] sm:$0xff] }
 0x10a   : > { %3109 = vmatpush3.bf16.msra.mxu0 %v3106_v53  ;;  %v959_v53 = vld [vmem:[#allocation7 + $0x160] sm:$0xff] }
 0x10b   : > { %3111 = vmatprep.subr.bf16.mxu0 %v3110_v56 }
 0x10d   : > { %2631 = vmatmul.mubr.msk.f32.vlgmr.msra.gmra.mrb[0].mxu0 %vm323_vm5, %v496_v38 }
 0x10e   : > { %3113 = vmatpush3.bf16.msra.mxu0 %v3110_v56  ;;  %v3182_v56 = vpack.c.bf16 %v960_v54, %v959_v53  ;;  %v1407_v53 = vld [vmem:[#allocation9 + $0x360] sm:$0xff]  ;;  %v1408_v54 = vld [vmem:[#allocation9 + $0x368] sm:$0xff] }
 0x10f   : > { %3115 = vmatprep.subr.bf16.mxu0 %v3114_v59 }
 0x112   : > { %3117 = vmatpush3.bf16.msra.mxu0 %v3114_v59  ;;  %v3186_v59 = vpack.c.bf16 %v962_v58, %v961_v57  ;;  %v3294_v57 = vpack.c.bf16 %v1408_v54, %v1407_v53  ;;  %v1233_v58 = vld [vmem:[#allocation9 + $0x1f8] sm:$0xff]  ;;  %v1206_v53 = vld [vmem:[#allocation9 + $0x28] sm:$0xff] }
 0x113   : > { %3119 = vmatprep.subr.bf16.mxu0 %v3118_v62 }
 0x116   : > { %3121 = vmatpush3.bf16.msra.mxu0 %v3118_v62  ;;  %v3190_v62 = vpack.c.bf16 %v1050_v61, %v1049_v60 }
 0x117   : > { %3123 = vmatprep.subr.bf16.mxu0 %v3122_v2 }
 0x11a   : > { %3125 = vmatpush3.bf16.msra.mxu0 %v3122_v2  ;;  %v3194_v2 = vpack.c.bf16 %v1052_v1, %v1051_v63  ;;  %v1409_v63 = vld [vmem:[#allocation9 + $0x370] sm:$0xff]  ;;  %v1410_v1 = vld [vmem:[#allocation9 + $0x378] sm:$0xff] }
 0x11b   : > { %3127 = vmatprep.subr.bf16.mxu0 %v3126_v5 }
 0x157   : > { %v588_v6 = vpop.permute.xlu1 %587 }
 0x158   : > { %2649 = vmatprep.mubr.msk.f32.mxu0 %vm323_vm5, %v588_v6 }
 0x15b   : > { %v590_v10 = vpop.permute.xlu1 %589 }
 0x15c   : > { %2650 = vmatmul.mubr.msk.f32.vlgmr.msra.gmra.mrb[0].mxu0 %vm323_vm5, %v590_v10 }
 0x15d   : > { %3129 = vmatpush3.bf16.msra.mxu0 %v3126_v5  ;;  %v1054_v5 = vld [vmem:[#allocation7 + $0x228] sm:$0xff] }
 0x15e   : > { %v682_v13 = vpop.permute.xlu0 %681  ;;  %3131 = vmatprep.subr.bf16.mxu0 %v3130_v9  ;;  %v3198_v7 = vpack.c.bf16 %v1054_v5, %v1053_v4 }
 0x15f   : > { %2668 = vmatprep.mubr.msk.f32.mxu0 %vm323_vm5, %v682_v13  ;;  %v684_v24 = vpop.permute.xlu1 %683  ;;  %v1219_v13 = vld [vmem:[#allocation9 + $0x188] sm:$0xff] }
 0x160   : > { %v3206_v15 = vpack.c.bf16 %v1219_v13, %v1218_v12 }
 0x161   : > { %3133 = vmatpush3.bf16.msra.mxu0 %v3130_v9  ;;  %v1056_v9 = vld [vmem:[#allocation7 + $0x238] sm:$0xff] }
 0x162   : > { %3135 = vmatprep.subr.bf16.mxu0 %v3134_v14  ;;  %v776_v27 = vpop.permute.xlu0 %775  ;;  %v3202_v10 = vpack.c.bf16 %v1056_v9, %v1055_v8 }
 0x163   : > { %v778_v38 = vpop.permute.xlu1 %777 }
 0x165   : > { %3137 = vmatpush3.bf16.msra.mxu0 %v3134_v14  ;;  %v1395_v14 = vld [vmem:[#allocation9 + $0x300] sm:$0xff] }
 0x166   : > { %3139 = vmatprep.subr.bf16.mxu0 %v3138_v17  ;;  %v870_v41 = vpop.permute.xlu0 %869  ;;  %v3270_v19 = vpack.c.bf16 %v1396_v16, %v1395_v14 }
 0x167   : > { %v872_v52 = vpop.permute.xlu1 %871 }
 0x168   : > { %3271 = vmatprep.subr.bf16.mxu1 %v3270_v19 }
 0x169   : > { %3141 = vmatpush3.bf16.msra.mxu0 %v3138_v17  ;;  %v1220_v17 = vld [vmem:[#allocation9 + $0x190] sm:$0xff]  ;;  %3273 = vmatpush3.bf16.msra.mxu1 %v3270_v19 }
 0x16a   : > { %3143 = vmatprep.subr.bf16.mxu0 %v3142_v20  ;;  %v964_v55 = vpop.permute.xlu0 %963 }
 0x16b   : > { %v966_v3 = vpop.permute.xlu1 %965 }
 0x16c   : > { %2669 = vmatmul.mubr.msk.f32.vlgmr.msra.gmra.mrb[0].mxu0 %vm323_vm5, %v684_v24  ;;  %v3274_v24 = vpack.c.bf16 %v1398_v22, %v1397_v21 }
 0x16d   : > { %3145 = vmatpush3.bf16.msra.mxu0 %v3142_v20  ;;  %2687 = vmatprep.mubr.msk.f32.mxu0 %vm323_vm5, %v776_v27  ;;  %v3210_v20 = vpack.c.bf16 %v1221_v18, %v1220_v17  ;;  %v1400_v27 = vld [vmem:[#allocation9 + $0x328] sm:$0xff]  ;;  %v1203_v18 = vld [vmem:[#allocation9 + $0x10] sm:$0xff] }
 0x16e   : > { %3147 = vmatprep.subr.bf16.mxu0 %v3146_v23  ;;  %v1058_v6 = vpop.permute.xlu0 %1057  ;;  %3275 = vmatprep.subr.bf16.mxu1 %v3274_v24  ;;  %v3278_v29 = vpack.c.bf16 %v1400_v27, %v1399_v26 }
 0x16f   : > { %v1060_v11 = vpop.permute.xlu1 %1059  ;;  %3277 = vmatpush3.bf16.msra.mxu1 %v3274_v24 }
 0x170   : > { %3279 = vmatprep.subr.bf16.mxu1 %v3278_v29 }
 0x171   : > { %3149 = vmatpush3.bf16.msra.mxu0 %v3146_v23  ;;  %v1222_v23 = vld [vmem:[#allocation9 + $0x1a0] sm:$0xff] }
 0x172   : > { %3151 = vmatprep.subr.bf16.mxu0 %v3150_v28 }
 0x173   : > { %3281 = vmatpush3.bf16.msra.mxu1 %v3278_v29 }
 0x174   : > { %3283 = vmatprep.subr.bf16.mxu1 %v3282_v35 }
 0x175   : > { %3153 = vmatpush3.bf16.msra.mxu0 %v3150_v28  ;;  %v3214_v28 = vpack.c.bf16 %v1223_v25, %v1222_v23  ;;  %v1204_v25 = vld [vmem:[#allocation9 + $0x18] sm:$0xff] }
 0x176   : > { %3155 = vmatprep.subr.bf16.mxu0 %v3154_v31 }
 0x177   : > { %3285 = vmatpush3.bf16.msra.mxu1 %v3282_v35 }
 0x179   : > { %3157 = vmatpush3.bf16.msra.mxu0 %v3154_v31  ;;  %v1225_v31 = vld [vmem:[#allocation9 + $0x1b8] sm:$0xff] }
 0x17a   : > { %3159 = vmatprep.subr.bf16.mxu0 %v3158_v34 }
 0x17c   : > { %2688 = vmatmul.mubr.msk.f32.vlgmr.msra.gmra.mrb[0].mxu0 %vm323_vm5, %v778_v38  ;;  %v1403_v38 = vld [vmem:[#allocation9 + $0x340] sm:$0xff] }
 0x17d   : > { %3161 = vmatpush3.bf16.msra.mxu0 %v3158_v34  ;;  %2706 = vmatprep.mubr.msk.f32.mxu0 %vm323_vm5, %v870_v41  ;;  %v3218_v34 = vpack.c.bf16 %v1225_v31, %v1224_v30  ;;  %v3286_v41 = vpack.c.bf16 %v1404_v39, %v1403_v38  ;;  %v3242_v38 = vpack.c.bf16 %v1204_v25, %v1203_v18  ;;  %v1213_v18 = vld [vmem:[#allocation9 + $0x60] sm:$0xff]  ;;  %v1215_v25 = vld [vmem:[#allocation9 + $0x70] sm:$0xff] }
 0x17e   : > { %3163 = vmatprep.subr.bf16.mxu0 %v3162_v37 }
 0x17f   : > { %3287 = vmatprep.subr.bf16.mxu1 %v3286_v41 }
 0x180   : > { %3289 = vmatpush3.bf16.msra.mxu1 %v3286_v41 }
 0x181   : > { %3165 = vmatpush3.bf16.msra.mxu0 %v3162_v37  ;;  %v1227_v37 = vld [vmem:[#allocation9 + $0x1c8] sm:$0xff] }
 0x182   : > { %3167 = vmatprep.subr.bf16.mxu0 %v3166_v42  ;;  %v3222_v40 = vpack.c.bf16 %v1227_v37, %v1226_v36 }
 0x185   : > { %3169 = vmatpush3.bf16.msra.mxu0 %v3166_v42  ;;  %v1153_v42 = vlaneseq }
 0x186   : > { %3171 = vmatprep.subr.bf16.mxu0 %v3170_v45 }
 0x187   : > { %vm1155_vm11 = vcmp.lt.s32.totalorder %v1153_v42, 144 }
 0x188   : > { %1157 = vst.msk [vmem:[#allocation3] ss:$8 sm:$0x3] %vm1155_vm11, %v3825_v0  ;;  %1160 = vst.msk [vmem:[#allocation3 + $0x21] ss:$8 sm:$0x3] %vm1155_vm11, %v3825_v0 }
 0x189   : > { %3173 = vmatpush3.bf16.msra.mxu0 %v3170_v45  ;;  %v3226_v45 = vpack.c.bf16 %v1229_v44, %v1228_v43  ;;  %v1504_v43 = vld [vmem:[#allocation9 + $0x90] sm:$0xff]  ;;  %v1505_v44 = vld [vmem:[#allocation9 + $0x98] sm:$0xff] }
 0x18a   : > { %3175 = vmatprep.subr.bf16.mxu0 %v3174_v48 }
 0x18c   : > { %2707 = vmatmul.mubr.msk.f32.vlgmr.msra.gmra.mrb[0].mxu0 %vm323_vm5, %v872_v52 }
 0x18d   : > { %3177 = vmatpush3.bf16.msra.mxu0 %v3174_v48  ;;  %2725 = vmatprep.mubr.msk.f32.mxu0 %vm323_vm5, %v964_v55  ;;  %v3290_v48 = vpack.c.bf16 %v1406_v47, %v1405_v46  ;;  %v1232_v55 = vld [vmem:[#allocation9 + $0x1f0] sm:$0xff] }
 0x18e   : > { %3179 = vmatprep.subr.bf16.mxu0 %v3178_v51  ;;  %v3234_v0 = vpack.c.bf16 %v1233_v58, %v1232_v55  ;;  %v3306_v55 = vpack.c.bf16 %v1505_v44, %v1504_v43  ;;  %v1506_v58 = vld [vmem:[#allocation9 + $0xa0] sm:$0xff] }
 0x18f   : > { %3291 = vmatprep.subr.bf16.mxu1 %v3290_v48 }
 0x190   : > { %3293 = vmatpush3.bf16.msra.mxu1 %v3290_v48 }
 0x191   : > { %3181 = vmatpush3.bf16.msra.mxu0 %v3178_v51  ;;  %v1231_v51 = vld [vmem:[#allocation9 + $0x1e8] sm:$0xff]  ;;  %3295 = vmatprep.subr.bf16.mxu1 %v3294_v57 }
 0x192   : > { %3183 = vmatprep.subr.bf16.mxu0 %v3182_v56  ;;  %v3230_v52 = vpack.c.bf16 %v1231_v51, %v1230_v50 }
 0x194   : > { %3297 = vmatpush3.bf16.msra.mxu1 %v3294_v57 }
 0x195   : > { %3185 = vmatpush3.bf16.msra.mxu0 %v3182_v56 }
 0x196   : > { %3187 = vmatprep.subr.bf16.mxu0 %v3186_v59 }
 0x199   : > { %3189 = vmatpush3.bf16.msra.mxu0 %v3186_v59 }
 0x19a   : > { %3191 = vmatprep.subr.bf16.mxu0 %v3190_v62 }
 0x19c   : > { %2726 = vmatmul.mubr.msk.f32.vlgmr.msra.gmra.mrb[0].mxu0 %vm323_vm5, %v966_v3  ;;  %v3298_v3 = vpack.c.bf16 %v1410_v1, %v1409_v63  ;;  %v1208_v63 = vld [vmem:[#allocation9 + $0x38] sm:$0xff] }
 0x19d   : > { %3193 = vmatpush3.bf16.msra.mxu0 %v3190_v62  ;;  %2744 = vmatprep.mubr.msk.f32.mxu0 %vm323_vm5, %v1058_v6  ;;  %v1201_v6 = vld [vmem:[#allocation9] sm:$0xff] }
 0x19e   : > { %3195 = vmatprep.subr.bf16.mxu0 %v3194_v2  ;;  %3299 = vmatprep.subr.bf16.mxu1 %v3298_v3 }
 0x19f   : > { %3301 = vmatpush3.bf16.msra.mxu1 %v3298_v3  ;;  %v1508_v3 = vld [vmem:[#allocation9 + $0xb0] sm:$0xff] }
 0x1a1   : > { %3197 = vmatpush3.bf16.msra.mxu0 %v3194_v2 }
 0x1a2   : > { %3199 = vmatprep.subr.bf16.mxu0 %v3198_v7 }
 0x1a5   : > { %3201 = vmatpush3.bf16.msra.mxu0 %v3198_v7  ;;  %v1202_v7 = vld [vmem:[#allocation9 + $0x8] sm:$0xff] }
 0x1a6   : > { %3203 = vmatprep.subr.bf16.mxu0 %v3202_v10  ;;  %v4112_v8 = vpack.c.bf16 %v1202_v7, %v1201_v6  ;;  %v1209_v6 = vld [vmem:[#allocation9 + $0x40] sm:$0xff]  ;;  %v1210_v7 = vld [vmem:[#allocation9 + $0x48] sm:$0xff] }
 0x1a9   : > { %3205 = vmatpush3.bf16.msra.mxu0 %v3202_v10  ;;  %v1502_v10 = vld [vmem:[#allocation9 + $0x80] sm:$0xff] }
 0x1aa   : > { %3207 = vmatprep.subr.bf16.mxu0 %v3206_v15 }
 0x1ac   : > { %2745 = vmatmul.mubr.msk.f32.vlgmr.msra.gmra.mrb[0].mxu0 %vm323_vm5, %v1060_v11  ;;  %v1503_v11 = vld [vmem:[#allocation9 + $0x88] sm:$0xff] }
 0x1ad   : > { %3209 = vmatpush3.bf16.msra.mxu0 %v3206_v15  ;;  %v4118_v12 = vpack.c.bf16 %v1503_v11, %v1502_v10  ;;  %v1511_v10 = vld [vmem:[#allocation9 + $0xc8] sm:$0xff]  ;;  %v3254_v11 = vpack.c.bf16 %v1210_v7, %v1209_v6 }
 0x1ae   : > { %3211 = vmatprep.subr.bf16.mxu0 %v3210_v20 }
 0x1af   : > { %3303 = vmatprep.subr.bf16.mxu1 %v4118_v12 }
 0x1b1   : > { %3213 = vmatpush3.bf16.msra.mxu0 %v3210_v20 }
 0x1b2   : > { %3215 = vmatprep.subr.bf16.mxu0 %v3214_v28 }
 0x1b5   : > { %3217 = vmatpush3.bf16.msra.mxu0 %v3214_v28 }
 0x1b6   : > { %3219 = vmatprep.subr.bf16.mxu0 %v3218_v34 }
 0x1b9   : > { %3221 = vmatpush3.bf16.msra.mxu0 %v3218_v34 }
 0x1ba   : > { %3223 = vmatprep.subr.bf16.mxu0 %v3222_v40 }
 0x1bd   : > { %3225 = vmatpush3.bf16.msra.mxu0 %v3222_v40 }
 0x1be   : > { %3227 = vmatprep.subr.bf16.mxu0 %v3226_v45 }
 0x1c1   : > { %3229 = vmatpush3.bf16.msra.mxu0 %v3226_v45 }
 0x1c2   : > { %3231 = vmatprep.subr.bf16.mxu0 %v3230_v52 }
 0x1c5   : > { %3233 = vmatpush3.bf16.msra.mxu0 %v3230_v52  ;;  %v1205_v52 = vld [vmem:[#allocation9 + $0x20] sm:$0xff] }
 0x1c6   : > { %3235 = vmatprep.subr.bf16.mxu0 %v3234_v0 }
 0x1c9   : > { %3237 = vmatpush3.bf16.msra.mxu0 %v3234_v0 }
 0x1ca   : > { %3239 = vmatprep.subr.bf16.mxu0 %v4112_v8 }
 0x27f   : > { %v2746_v56 = vpop.f32.mrb[0].mxu0 }
 0x280   : > { %v1150_v59 = vadd.f32 %v2746_v56, %v2315_v49  ;;  %v1131_v60 = vpop.f32.mrb[1].mxu0 }
 0x281   : > { %v1149_v61 = vadd.f32 %v2315_v49, %v1131_v60 }
 0x282   : > { %v1152_v62 = vmax.f32 %v1150_v59, 0.0  ;;  %v1507_v59 = vld [vmem:[#allocation9 + $0xa8] sm:$0xff] }
 0x283   : > { %v1151_v2 = vmax.f32 %v1149_v61, 0.0  ;;  %v3246_v61 = vpack.c.bf16 %v1206_v53, %v1205_v52  ;;  %v3310_v1 = vpack.c.bf16 %v1507_v59, %v1506_v58  ;;  %v1619_v52 = vld [vmem:[#allocation9 + $0x230] sm:$0xff]  ;;  %v1620_v53 = vld [vmem:[#allocation9 + $0x238] sm:$0xff] }
 0x284   : > { %v1178_v4 = vrot.slane %v1152_v62, 7  ;;  %v1207_v62 = vld [vmem:[#allocation9 + $0x30] sm:$0xff]  ;;  %v1624_v59 = vld [vmem:[#allocation9 + $0x258] sm:$0xff] }
 0x285   : > { %v1177_v5 = vrot.slane %v1151_v2, 7  ;;  %v1623_v58 = vld [vmem:[#allocation9 + $0x250] sm:$0xff] }
 0x287   : > { %1180 = vrot.lane.b32.xlu0 %v1177_v5, %s3829_s28  ;;  %v1179_v9 = vsel %vm1176_vm14, %v1177_v5, %v1178_v4  ;;  %v3250_v5 = vpack.c.bf16 %v1208_v63, %v1207_v62  ;;  %v1627_v63 = vld [vmem:[#allocation9 + $0x270] sm:$0xff] }
 0x288   : > { %1182 = vrot.lane.b32.xlu1 %v1179_v9, %s3829_s28  ;;  %v1510_v9 = vld [vmem:[#allocation9 + $0xc0] sm:$0xff] }
 0x28b   : > { %1184 = vrot.lane.b32.xlu0 %v1178_v4, %s3829_s28  ;;  %v1509_v4 = vld [vmem:[#allocation9 + $0xb8] sm:$0xff] }
 0x2f9   : > { %v1181_v13 = vpop.permute.xlu0 %1180 }
 0x2fa   : > { %1190 = vst.msk [vmem:[#allocation3] sm:$0xfe] %vm1189_vm15, %v1181_v13  ;;  %v1183_v14 = vpop.permute.xlu1 %1182 }
 0x2fb   : > { %1191 = vst.msk [vmem:[#allocation3 + $0x8] sm:$0xfe] %vm1162_vm7, %v1181_v13  ;;  %v1212_v13 = vld [vmem:[#allocation9 + $0x58] sm:$0xff] }
 0x2fc   : > { %1193 = vst.msk [vmem:[#allocation3 + $0x10] sm:$0xff] %vm1192_vm0, %v1183_v14 }
 0x2fd   : > { %1194 = vst.msk [vmem:[#allocation3 + $0x18] sm:$0xff] %vm1164_vm9, %v1183_v14  ;;  %v1185_v15 = vpop.permute.xlu0 %1184  ;;  %v3318_v14 = vpack.c.bf16 %v1511_v10, %v1510_v9  ;;  %v1733_v10 = vld [vmem:[#allocation9 + $0x390] sm:$0xff] }
 0x2fe   : > { %1196 = vst.msk [vmem:[#allocation3 + $0x20] sm:$0x1] %vm1195_vm1, %v1185_v15 }
 0x2ff   : > { %1197 = vst.msk [vmem:[#allocation3 + $0x28] sm:$0x1] %vm1166_vm12, %v1185_v15  ;;  %v1512_v15 = vld [vmem:[#allocation9 + $0xd0] sm:$0xff] }
 0x301   : > { %v1495_v16 = vld [vmem:[#allocation3] sm:$0xff] }
 0x302   : > { %v1496_v17 = vld [vmem:[#allocation3 + $0x8] sm:$0xff]  ;;  %v1237_v22 = vrot.slane %v1495_v16, 1  ;;  %v1411_v23 = vrot.slane %v1495_v16, 2 }
 0x303   : > { %v4124_v19 = vpack.i.bf16 %v1496_v17, %v1495_v16  ;;  %v4126_v20 = vld [vmem:[#allocation3 + $0x10] sm:$0xff]  ;;  %v1634_v24 = vrot.slane %v1496_v17, 1  ;;  %v1750_v30 = vrot.slane %v1496_v17, 2 }
 0x304   : > { %v1498_v21 = vld [vmem:[#allocation3 + $0x18] sm:$0xff]  ;;  %v1238_v27 = vrot.slane %v4126_v20, 1  ;;  %v1412_v28 = vrot.slane %v4126_v20, 2 }
 0x305   : > { %v4129_v26 = vpack.i.bf16 %v1498_v21, %v4126_v20  ;;  %v1635_v29 = vrot.slane %v1498_v21, 1  ;;  %3603 = vrot.lane.b32.xlu1 %v4124_v19, %s3828_s15  ;;  %v1751_v31 = vrot.slane %v1498_v21, 2  ;;  %v1200_v35 = vld [vmem:[#allocation3 + $0x20] sm:$0x3] }
 0x306   : > { %v1239_v32 = vsel %vm317_vm4, %v1237_v22, %v1238_v27  ;;  %v1413_v33 = vsel %vm491_vm6, %v1411_v23, %v1412_v28  ;;  %v1499_v36 = vld [vmem:[#allocation3 + $0x20] sm:$0x3]  ;;  %v1500_v37 = vld [vmem:[#allocation3 + $0x28] sm:$0x3]  ;;  %v1240_v40 = vrot.slane %v1200_v35, 1  ;;  %v1414_v41 = vrot.slane %v1200_v35, 2 }
 0x307   : > { %3608 = vrot.lane.b32.xlu0 %v4129_v26, %s3828_s15  ;;  %v1636_v34 = vsel %vm317_vm4, %v1634_v24, %v1635_v29  ;;  %2779 = vmatprep.mubr.f32.mxu0 %v1239_v32  ;;  %v1637_v42 = vrot.slane %v1499_v36, 1  ;;  %v1639_v45 = vrot.slane %v1500_v37, 1  ;;  %v1752_v46 = vsel %vm491_vm6, %v1750_v30, %v1751_v31  ;;  %v1514_v22 = vld [vmem:[#allocation9 + $0xe0] sm:$0xff]  ;;  %v1515_v23 = vld [vmem:[#allocation9 + $0xe8] sm:$0xff] }
 0x308   : > { %2849 = vmatprep.mubr.f32.mxu1 %v1413_v33  ;;  %v3612_v39 = vpack.i.bf16 %v1636_v34, %v1239_v32  ;;  %v1753_v47 = vrot.slane %v1499_v36, 2  ;;  %v1755_v48 = vrot.slane %v1500_v37, 2  ;;  %v1241_v49 = vsel %vm317_vm4, %v1238_v27, %v1240_v40  ;;  %v1613_v32 = vld [vmem:[#allocation9 + $0x200] sm:$0xff]  ;;  %v1615_v36 = vld [vmem:[#allocation9 + $0x210] sm:$0xff]  ;;  %v1616_v37 = vld [vmem:[#allocation9 + $0x218] sm:$0xff] }
 0x309   : > { %v1415_v50 = vsel %vm491_vm6, %v1412_v28, %v1414_v41  ;;  %v1638_v51 = vsel %vm317_vm4, %v1238_v27, %v1637_v42  ;;  %2780 = vmatmul.mubr.f32.vlgmr.msra.gmra.mrb[2].mxu0 %v1241_v49  ;;  %v1640_v54 = vsel %vm317_vm4, %v1635_v29, %v1639_v45  ;;  %v3622_v57 = vpack.i.bf16 %v1752_v46, %v1413_v33  ;;  %v1517_v29 = vld [vmem:[#allocation9 + $0xf8] sm:$0xff]  ;;  %v1614_v33 = vld [vmem:[#allocation9 + $0x208] sm:$0xff] }
 0x30a   : > { %3613 = vrot.lane.b32.xlu1 %v3612_v39, %s3828_s15  ;;  %2850 = vmatmul.mubr.f32.vlgmr.msra.gmra.mrb[0].mxu1 %v1415_v50  ;;  %v3617_v56 = vpack.i.bf16 %v1640_v54, %v1638_v51  ;;  %v1754_v60 = vsel %vm491_vm6, %v1412_v28, %v1753_v47  ;;  %v1756_v0 = vsel %vm491_vm6, %v1751_v31, %v1755_v48  ;;  %v1516_v28 = vld [vmem:[#allocation9 + $0xf0] sm:$0xff]  ;;  %v1617_v47 = vld [vmem:[#allocation9 + $0x220] sm:$0xff]  ;;  %v1618_v48 = vld [vmem:[#allocation9 + $0x228] sm:$0xff] }
 0x30b   : > { %3241 = vmatpush3.bf16.msra.mxu0 %v4112_v8  ;;  %2814 = vmatprep.mubr.f32.mxu0 %v1495_v16  ;;  %v3627_v2 = vpack.i.bf16 %v1756_v0, %v1754_v60  ;;  %v3314_v8 = vpack.c.bf16 %v1509_v4, %v1508_v3  ;;  %v1513_v16 = vld [vmem:[#allocation9 + $0xd8] sm:$0xff]  ;;  %v3326_v27 = vpack.c.bf16 %v1515_v23, %v1514_v22  ;;  %v1625_v0 = vld [vmem:[#allocation9 + $0x260] sm:$0xff]  ;;  %v1732_v4 = vld [vmem:[#allocation9 + $0x388] sm:$0xff] }
 0x30c   : > { %3243 = vmatprep.subr.bf16.mxu0 %v3242_v38  ;;  %3305 = vmatpush3.bf16.msra.mxu1 %v4118_v12  ;;  %v1211_v12 = vld [vmem:[#allocation9 + $0x50] sm:$0xff]  ;;  %v3322_v21 = vpack.c.bf16 %v1513_v16, %v1512_v15  ;;  %v3330_v31 = vpack.c.bf16 %v1517_v29, %v1516_v28  ;;  %v3334_v34 = vpack.c.bf16 %v1614_v33, %v1613_v32  ;;  %v1731_v3 = vld [vmem:[#allocation9 + $0x380] sm:$0xff]  ;;  %v1738_v22 = vld [vmem:[#allocation9 + $0x3b8] sm:$0xff] }
 0x30d   : > { %3618 = vrot.lane.b32.xlu0 %v3617_v56, %s3828_s15  ;;  %3307 = vmatprep.subr.bf16.mxu1 %v3306_v55  ;;  %v3258_v17 = vpack.c.bf16 %v1212_v13, %v1211_v12  ;;  %v3338_v44 = vpack.c.bf16 %v1616_v37, %v1615_v36  ;;  %v3342_v51 = vpack.c.bf16 %v1618_v48, %v1617_v47  ;;  %v1735_v16 = vld [vmem:[#allocation9 + $0x3a0] sm:$0xff]  ;;  %v1742_v28 = vld [vmem:[#allocation9 + $0x3d8] sm:$0xff]  ;;  %v1745_v33 = vld [vmem:[#allocation9 + $0x3f0] sm:$0xff] }
 0x30e   : > { %3623 = vrot.lane.b32.xlu1 %v3622_v57, %s3828_s15  ;;  %v3346_v54 = vpack.c.bf16 %v1620_v53, %v1619_v52  ;;  %v3354_v60 = vpack.c.bf16 %v1624_v59, %v1623_v58  ;;  %v3366_v7 = vpack.c.bf16 %v1732_v4, %v1731_v3  ;;  %v1847_v36 = vld [vmem:[#allocation9 + $0x100] sm:$0xff]  ;;  %v1848_v37 = vld [vmem:[#allocation9 + $0x108] sm:$0xff]  ;;  %v1853_v52 = vld [vmem:[#allocation9 + $0x130] sm:$0xff] }
 0x30f   : > { %3245 = vmatpush3.bf16.msra.mxu0 %v3242_v38  ;;  %v1854_v53 = vld [vmem:[#allocation9 + $0x138] sm:$0xff]  ;;  %v1857_v58 = vld [vmem:[#allocation9 + $0x150] sm:$0xff]  ;;  %v1954_v3 = vld [vmem:[#allocation9 + $0x280] sm:$0xff] }
 0x310   : > { %3247 = vmatprep.subr.bf16.mxu0 %v3246_v61  ;;  %3309 = vmatpush3.bf16.msra.mxu1 %v3306_v55  ;;  %v1621_v55 = vld [vmem:[#allocation9 + $0x240] sm:$0xff]  ;;  %v1858_v59 = vld [vmem:[#allocation9 + $0x158] sm:$0xff]  ;;  %v1955_v4 = vld [vmem:[#allocation9 + $0x288] sm:$0xff] }
 0x311   : > { %3628 = vrot.lane.b32.xlu0 %v3627_v2, %s3828_s15  ;;  %3311 = vmatprep.subr.bf16.mxu1 %v3310_v1  ;;  %s3752_s15 = sshll.u32 %s3831_s22, 4  ;;  %s3753_s15 = int_to_ptr.vmem [resolvable:$false] %s3752_s15 }
 0x312   : > { %3633 = vrot.lane.b32.xlu1 %v4124_v19, %s3830_s13  ;;  %v1214_v19 = vld [vmem:[#allocation9 + $0x68] sm:$0xff]  ;;  %s3754_s16 = scalar_lea.vmem %s3753_s15, 512  ;;  %p3755_p7 = scmp.lt.s32.totalorder %s4180_s17, %s3753_s15 }
 0x313   : > { %3249 = vmatpush3.bf16.msra.mxu0 %v3246_v61  ;;  %v3262_v24 = vpack.c.bf16 %v1214_v19, %v1213_v18  ;;  %v1626_v61 = vld [vmem:[#allocation9 + $0x268] sm:$0xff]  ;;  %p3756_p9 = scmp.lt.s32.totalorder %s3754_s16, %s3748_s26 }
 0x314   : > { %3251 = vmatprep.subr.bf16.mxu0 %v3250_v5  ;;  %3313 = vmatpush3.bf16.msra.mxu1 %v3310_v1  ;;  %v3358_v62 = vpack.c.bf16 %v1626_v61, %v1625_v0  ;;  %v1628_v1 = vld [vmem:[#allocation9 + $0x278] sm:$0xff]  ;;  %v1859_v0 = vld [vmem:[#allocation9 + $0x160] sm:$0xff]  ;;  %v1860_v61 = vld [vmem:[#allocation9 + $0x168] sm:$0xff] }
 0x315   : > { %3638 = vrot.lane.b32.xlu0 %v4129_v26, %s3830_s13  ;;  %3315 = vmatprep.subr.bf16.mxu1 %v3314_v8  ;;  %v1216_v26 = vld [vmem:[#allocation9 + $0x78] sm:$0xff]  ;;  %p3757_p12 = por %p3756_p9, %p3755_p7 }
 0x316   : > { %3643 = vrot.lane.b32.xlu1 %v3612_v39, %s3830_s13  ;;  %v3266_v30 = vpack.c.bf16 %v1216_v26, %v1215_v25  ;;  %v1740_v25 = vld [vmem:[#allocation9 + $0x3c8] sm:$0xff] }
 0x317   : > { %3253 = vmatpush3.bf16.msra.mxu0 %v3250_v5  ;;  %p3758_p1 = pnand %p3757_p12, %p3751_p3 }
 0x318   : > { %3255 = vmatprep.subr.bf16.mxu0 %v3254_v11  ;;  %3317 = vmatpush3.bf16.msra.mxu1 %v3314_v8 }
 0x319   : > { %3648 = vrot.lane.b32.xlu0 %v3617_v56, %s3830_s13  ;;  %3319 = vmatprep.subr.bf16.mxu1 %v3318_v14  ;;  %v1622_v56 = vld [vmem:[#allocation9 + $0x248] sm:$0xff] }
 0x31a   : > { %3653 = vrot.lane.b32.xlu1 %v3622_v57, %s3830_s13  ;;  %v3350_v57 = vpack.c.bf16 %v1622_v56, %v1621_v55  ;;  %v1855_v55 = vld [vmem:[#allocation9 + $0x140] sm:$0xff]  ;;  %v1856_v56 = vld [vmem:[#allocation9 + $0x148] sm:$0xff] }
 0x31b   : > { %3257 = vmatpush3.bf16.msra.mxu0 %v3254_v11  ;;  %v1734_v11 = vld [vmem:[#allocation9 + $0x398] sm:$0xff] }
 0x31c   : > { %3259 = vmatprep.subr.bf16.mxu0 %v3258_v17  ;;  %3321 = vmatpush3.bf16.msra.mxu1 %v3318_v14  ;;  %v3370_v14 = vpack.c.bf16 %v1734_v11, %v1733_v10  ;;  %v1956_v10 = vld [vmem:[#allocation9 + $0x290] sm:$0xff]  ;;  %v1957_v11 = vld [vmem:[#allocation9 + $0x298] sm:$0xff] }
 0x31d   : > { %3658 = vrot.lane.b32.xlu0 %v3627_v2, %s3830_s13  ;;  %3323 = vmatprep.subr.bf16.mxu1 %v3322_v21  ;;  %v3362_v2 = vpack.c.bf16 %v1628_v1, %v1627_v63  ;;  %v1861_v63 = vld [vmem:[#allocation9 + $0x170] sm:$0xff]  ;;  %v1862_v1 = vld [vmem:[#allocation9 + $0x178] sm:$0xff] }
 0x31f   : > { %3261 = vmatpush3.bf16.msra.mxu0 %v3258_v17  ;;  %v1736_v17 = vld [vmem:[#allocation9 + $0x3a8] sm:$0xff] }
 0x320   : > { %3263 = vmatprep.subr.bf16.mxu0 %v3262_v24  ;;  %3325 = vmatpush3.bf16.msra.mxu1 %v3322_v21  ;;  %v3374_v19 = vpack.c.bf16 %v1736_v17, %v1735_v16  ;;  %v1737_v21 = vld [vmem:[#allocation9 + $0x3b0] sm:$0xff]  ;;  %v1958_v16 = vld [vmem:[#allocation9 + $0x2a0] sm:$0xff]  ;;  %v1959_v17 = vld [vmem:[#allocation9 + $0x2a8] sm:$0xff] }
 0x321   : > { %3327 = vmatprep.subr.bf16.mxu1 %v3326_v27  ;;  %v3378_v23 = vpack.c.bf16 %v1738_v22, %v1737_v21  ;;  %v1960_v21 = vld [vmem:[#allocation9 + $0x2b0] sm:$0xff]  ;;  %v1961_v22 = vld [vmem:[#allocation9 + $0x2b8] sm:$0xff] }
 0x323   : > { %3265 = vmatpush3.bf16.msra.mxu0 %v3262_v24  ;;  %v1739_v24 = vld [vmem:[#allocation9 + $0x3c0] sm:$0xff] }
 0x324   : > { %3267 = vmatprep.subr.bf16.mxu0 %v3266_v30  ;;  %3329 = vmatpush3.bf16.msra.mxu1 %v3326_v27  ;;  %v3382_v26 = vpack.c.bf16 %v1740_v25, %v1739_v24  ;;  %v1741_v27 = vld [vmem:[#allocation9 + $0x3d0] sm:$0xff]  ;;  %v1962_v24 = vld [vmem:[#allocation9 + $0x2c0] sm:$0xff]  ;;  %v1963_v25 = vld [vmem:[#allocation9 + $0x2c8] sm:$0xff] }
 0x325   : > { %3331 = vmatprep.subr.bf16.mxu1 %v3330_v31  ;;  %v3386_v29 = vpack.c.bf16 %v1742_v28, %v1741_v27  ;;  %v1964_v27 = vld [vmem:[#allocation9 + $0x2d0] sm:$0xff]  ;;  %v1965_v28 = vld [vmem:[#allocation9 + $0x2d8] sm:$0xff] }
 0x327   : > { %3269 = vmatpush3.bf16.msra.mxu0 %v3266_v30  ;;  %v1743_v30 = vld [vmem:[#allocation9 + $0x3e0] sm:$0xff] }
 0x328   : > { %3333 = vmatpush3.bf16.msra.mxu1 %v3330_v31  ;;  %v1744_v31 = vld [vmem:[#allocation9 + $0x3e8] sm:$0xff] }
 0x329   : > { %3335 = vmatprep.subr.bf16.mxu1 %v3334_v34  ;;  %v3390_v32 = vpack.c.bf16 %v1744_v31, %v1743_v30  ;;  %v1966_v30 = vld [vmem:[#allocation9 + $0x2e0] sm:$0xff]  ;;  %v1967_v31 = vld [vmem:[#allocation9 + $0x2e8] sm:$0xff] }
 0x32a   : > { %2815 = vmatmul.mubr.f32.vlgmr.msra.gmra.mrb[2].mxu0 %v4126_v20 }
 0x377   : > { %v3604_v35 = vpop.permute.xlu1 %3603 }
 0x378   : > { %v3606_v38 = vunpack.i.h.bf16 %v3604_v35  ;;  %v3605_v39 = vunpack.i.l.bf16 %v3604_v35 }
 0x379   : > { %v3609_v40 = vpop.permute.xlu0 %3608 }
 0x37a   : > { %v3611_v41 = vunpack.i.h.bf16 %v3609_v40  ;;  %v3610_v42 = vunpack.i.l.bf16 %v3609_v40  ;;  %v1531_v43 = vsel %vm1530_vm2, %v3605_v39, %v3606_v38  ;;  %v3398_v40 = vpack.c.bf16 %v1848_v37, %v1847_v36  ;;  %v2060_v36 = vld [vmem:[#allocation9 + $0x400] sm:$0xff]  ;;  %v2061_v37 = vld [vmem:[#allocation9 + $0x408] sm:$0xff] }
 0x37b   : > { %2884 = vmatprep.mubr.f32.mxu1 %v1531_v43  ;;  %v1849_v43 = vld [vmem:[#allocation9 + $0x110] sm:$0xff] }
 0x37c   : > { %v3614_v45 = vpop.permute.xlu1 %3613  ;;  %v1532_v46 = vsel %vm1530_vm2, %v3610_v42, %v3611_v41 }
 0x37d   : > { %v3616_v49 = vunpack.i.h.bf16 %v3614_v45  ;;  %v3615_v20 = vunpack.i.l.bf16 %v3614_v45  ;;  %2885 = vmatmul.mubr.f32.vlgmr.msra.gmra.mrb[0].mxu1 %v1532_v46 }
 0x37e   : > { %3337 = vmatpush3.bf16.msra.mxu1 %v3334_v34  ;;  %v1746_v34 = vld [vmem:[#allocation9 + $0x3f8] sm:$0xff] }
 0x37f   : > { %3339 = vmatprep.subr.bf16.mxu1 %v3338_v44  ;;  %v1649_v50 = vsel %vm1530_vm2, %v3615_v20, %v3616_v49  ;;  %v3619_v5 = vpop.permute.xlu0 %3618  ;;  %v3394_v35 = vpack.c.bf16 %v1746_v34, %v1745_v33  ;;  %v1851_v49 = vld [vmem:[#allocation9 + $0x120] sm:$0xff]  ;;  %v1852_v20 = vld [vmem:[#allocation9 + $0x128] sm:$0xff]  ;;  %v1968_v33 = vld [vmem:[#allocation9 + $0x2f0] sm:$0xff] }
 0x380   : > { %2919 = vmatprep.mubr.f32.mxu1 %v1649_v50  ;;  %v3624_v6 = vpop.permute.xlu1 %3623  ;;  %v3621_v8 = vunpack.i.h.bf16 %v3619_v5  ;;  %v3620_v9 = vunpack.i.l.bf16 %v3619_v5  ;;  %v1969_v34 = vld [vmem:[#allocation9 + $0x2f8] sm:$0xff] }
 0x381   : > { %v3626_v12 = vunpack.i.h.bf16 %v3624_v6  ;;  %v3625_v13 = vunpack.i.l.bf16 %v3624_v6 }
 0x382   : > { %3341 = vmatpush3.bf16.msra.mxu1 %v3338_v44  ;;  %v1650_v15 = vsel %vm1530_vm2, %v3620_v9, %v3621_v8  ;;  %v1850_v44 = vld [vmem:[#allocation9 + $0x118] sm:$0xff] }
 0x383   : > { %3343 = vmatprep.subr.bf16.mxu1 %v3342_v51  ;;  %v1765_v18 = vsel %vm1530_vm2, %v3625_v13, %v3626_v12  ;;  %v3629_v38 = vpop.permute.xlu0 %3628  ;;  %v3402_v47 = vpack.c.bf16 %v1850_v44, %v1849_v43  ;;  %v2062_v43 = vld [vmem:[#allocation9 + $0x410] sm:$0xff]  ;;  %v2063_v44 = vld [vmem:[#allocation9 + $0x418] sm:$0xff] }
 0x384   : > { %v3634_v39 = vpop.permute.xlu1 %3633  ;;  %v3631_v41 = vunpack.i.h.bf16 %v3629_v38  ;;  %v3630_v42 = vunpack.i.l.bf16 %v3629_v38 }
 0x385   : > { %v3636_v45 = vunpack.i.h.bf16 %v3634_v39  ;;  %v3635_v46 = vunpack.i.l.bf16 %v3634_v39 }
 0x386   : > { %3345 = vmatpush3.bf16.msra.mxu1 %v3342_v51  ;;  %v1766_v48 = vsel %vm1530_vm2, %v3630_v42, %v3631_v41  ;;  %v3406_v51 = vpack.c.bf16 %v1852_v20, %v1851_v49  ;;  %v2064_v49 = vld [vmem:[#allocation9 + $0x420] sm:$0xff]  ;;  %v2065_v20 = vld [vmem:[#allocation9 + $0x428] sm:$0xff] }
 0x387   : > { %3347 = vmatprep.subr.bf16.mxu1 %v3346_v54  ;;  %v1872_v50 = vsel %vm1871_vm3, %v3635_v46, %v3636_v45  ;;  %v3639_v5 = vpop.permute.xlu0 %3638 }
 0x388   : > { %v3644_v6 = vpop.permute.xlu1 %3643  ;;  %v3641_v8 = vunpack.i.h.bf16 %v3639_v5  ;;  %v3640_v9 = vunpack.i.l.bf16 %v3639_v5 }
 0x389   : > { %v3646_v12 = vunpack.i.h.bf16 %v3644_v6  ;;  %v3645_v13 = vunpack.i.l.bf16 %v3644_v6 }
 0x38a   : > { %3349 = vmatpush3.bf16.msra.mxu1 %v3346_v54  ;;  %v3410_v54 = vpack.c.bf16 %v1854_v53, %v1853_v52  ;;  %v3470_v53 = vpack.c.bf16 %v2065_v20, %v2064_v49 }
 0x38b   : > { %3351 = vmatprep.subr.bf16.mxu1 %v3350_v57  ;;  %v3649_v38 = vpop.permute.xlu0 %3648 }
 0x38c   : > { %v3654_v39 = vpop.permute.xlu1 %3653  ;;  %v3651_v41 = vunpack.i.h.bf16 %v3649_v38  ;;  %v3650_v42 = vunpack.i.l.bf16 %v3649_v38 }
 0x38d   : > { %v3656_v45 = vunpack.i.h.bf16 %v3654_v39  ;;  %v3655_v46 = vunpack.i.l.bf16 %v3654_v39 }
 0x38e   : > { %3353 = vmatpush3.bf16.msra.mxu1 %v3350_v57  ;;  %v3414_v57 = vpack.c.bf16 %v1856_v56, %v1855_v55  ;;  %v2067_v55 = vld [vmem:[#allocation9 + $0x438] sm:$0xff] }
 0x38f   : > { %3355 = vmatprep.subr.bf16.mxu1 %v3354_v60  ;;  %v3659_v5 = vpop.permute.xlu0 %3658 }
 0x390   : > { %v3661_v6 = vunpack.i.h.bf16 %v3659_v5 }
 0x392   : > { %3357 = vmatpush3.bf16.msra.mxu1 %v3354_v60  ;;  %v3418_v60 = vpack.c.bf16 %v1858_v59, %v1857_v58  ;;  %v2069_v58 = vld [vmem:[#allocation9 + $0x448] sm:$0xff] }
 0x393   : > { %3359 = vmatprep.subr.bf16.mxu1 %v3358_v62 }
 0x396   : > { %3361 = vmatpush3.bf16.msra.mxu1 %v3358_v62  ;;  %v3422_v62 = vpack.c.bf16 %v1860_v61, %v1859_v0  ;;  %v2071_v0 = vld [vmem:[#allocation9 + $0x458] sm:$0xff] }
 0x397   : > { %3363 = vmatprep.subr.bf16.mxu1 %v3362_v2 }
 0x39a   : > { %3365 = vmatpush3.bf16.msra.mxu1 %v3362_v2  ;;  %v3426_v2 = vpack.c.bf16 %v1862_v1, %v1861_v63  ;;  %v2073_v63 = vld [vmem:[#allocation9 + $0x468] sm:$0xff] }
 0x39b   : > { %3367 = vmatprep.subr.bf16.mxu1 %v3366_v7 }
 0x39d   : > { %2920 = vmatmul.mubr.f32.vlgmr.msra.gmra.mrb[0].mxu1 %v1650_v15  ;;  %v1873_v15 = vsel %vm1871_vm3, %v3640_v9, %v3641_v8 }
 0x39e   : > { %3369 = vmatpush3.bf16.msra.mxu1 %v3366_v7  ;;  %2954 = vmatprep.mubr.f32.mxu1 %v1765_v18  ;;  %v3430_v7 = vpack.c.bf16 %v1955_v4, %v1954_v3  ;;  %v1978_v18 = vsel %vm1871_vm3, %v3645_v13, %v3646_v12  ;;  %v2075_v3 = vld [vmem:[#allocation9 + $0x478] sm:$0xff] }
 0x39f   : > { %3371 = vmatprep.subr.bf16.mxu1 %v3370_v14 }
 0x3a2   : > { %3373 = vmatpush3.bf16.msra.mxu1 %v3370_v14  ;;  %v3434_v14 = vpack.c.bf16 %v1957_v11, %v1956_v10  ;;  %v2316_v10 = vld [vmem:[%s4234_s4] ss:$0 sm:$0xff] }
 0x3a3   : > { %3375 = vmatprep.subr.bf16.mxu1 %v3374_v19 }
 0x3a6   : > { %3377 = vmatpush3.bf16.msra.mxu1 %v3374_v19  ;;  %v3438_v19 = vpack.c.bf16 %v1959_v17, %v1958_v16 }
 0x3a7   : > { %3379 = vmatprep.subr.bf16.mxu1 %v3378_v23 }
 0x3aa   : > { %3381 = vmatpush3.bf16.msra.mxu1 %v3378_v23  ;;  %v3442_v23 = vpack.c.bf16 %v1961_v22, %v1960_v21 }
 0x3ab   : > { %3383 = vmatprep.subr.bf16.mxu1 %v3382_v26 }
 0x3ae   : > { %3385 = vmatpush3.bf16.msra.mxu1 %v3382_v26  ;;  %v3446_v26 = vpack.c.bf16 %v1963_v25, %v1962_v24 }
 0x3af   : > { %3387 = vmatprep.subr.bf16.mxu1 %v3386_v29 }
 0x3b2   : > { %3389 = vmatpush3.bf16.msra.mxu1 %v3386_v29  ;;  %v3450_v29 = vpack.c.bf16 %v1965_v28, %v1964_v27 }
 0x3b3   : > { %3391 = vmatprep.subr.bf16.mxu1 %v3390_v32 }
 0x3b6   : > { %3393 = vmatpush3.bf16.msra.mxu1 %v3390_v32  ;;  %v3454_v32 = vpack.c.bf16 %v1967_v31, %v1966_v30 }
 0x3b7   : > { %3395 = vmatprep.subr.bf16.mxu1 %v3394_v35 }
 0x3ba   : > { %3397 = vmatpush3.bf16.msra.mxu1 %v3394_v35  ;;  %v3458_v35 = vpack.c.bf16 %v1969_v34, %v1968_v33 }
 0x3bb   : > { %3399 = vmatprep.subr.bf16.mxu1 %v3398_v40 }
 0x3bd   : > { %2955 = vmatmul.mubr.f32.vlgmr.msra.gmra.mrb[0].mxu1 %v1766_v48  ;;  %v1979_v48 = vsel %vm1871_vm3, %v3650_v42, %v3651_v41 }
 0x3be   : > { %3401 = vmatpush3.bf16.msra.mxu1 %v3398_v40  ;;  %2989 = vmatprep.mubr.f32.mxu1 %v1872_v50  ;;  %v3462_v40 = vpack.c.bf16 %v2061_v37, %v2060_v36  ;;  %v2084_v50 = vsel %vm1871_vm3, %v3655_v46, %v3656_v45 }
 0x3bf   : > { %3403 = vmatprep.subr.bf16.mxu1 %v3402_v47 }
 0x3c2   : > { %3405 = vmatpush3.bf16.msra.mxu1 %v3402_v47  ;;  %v3466_v47 = vpack.c.bf16 %v2063_v44, %v2062_v43 }
 0x3c3   : > { %3407 = vmatprep.subr.bf16.mxu1 %v3406_v51 }
 0x3c6   : > { %3409 = vmatpush3.bf16.msra.mxu1 %v3406_v51 }
 0x3c7   : > { %3411 = vmatprep.subr.bf16.mxu1 %v3410_v54 }
 0x3ca   : > { %3413 = vmatpush3.bf16.msra.mxu1 %v3410_v54  ;;  %v2066_v54 = vld [vmem:[#allocation9 + $0x430] sm:$0xff] }
 0x3cb   : > { %3415 = vmatprep.subr.bf16.mxu1 %v3414_v57  ;;  %v3474_v56 = vpack.c.bf16 %v2067_v55, %v2066_v54 }
 0x3ce   : > { %3417 = vmatpush3.bf16.msra.mxu1 %v3414_v57  ;;  %v2068_v57 = vld [vmem:[#allocation9 + $0x440] sm:$0xff] }
 0x3cf   : > { %3419 = vmatprep.subr.bf16.mxu1 %v3418_v60  ;;  %v3478_v59 = vpack.c.bf16 %v2069_v58, %v2068_v57 }
 0x3d2   : > { %3421 = vmatpush3.bf16.msra.mxu1 %v3418_v60  ;;  %v2070_v60 = vld [vmem:[#allocation9 + $0x450] sm:$0xff] }
 0x3d3   : > { %3423 = vmatprep.subr.bf16.mxu1 %v3422_v62  ;;  %v3482_v61 = vpack.c.bf16 %v2071_v0, %v2070_v60 }
 0x3d6   : > { %3425 = vmatpush3.bf16.msra.mxu1 %v3422_v62  ;;  %v2072_v62 = vld [vmem:[#allocation9 + $0x460] sm:$0xff] }
 0x3d7   : > { %3427 = vmatprep.subr.bf16.mxu1 %v3426_v2  ;;  %v3486_v1 = vpack.c.bf16 %v2073_v63, %v2072_v62 }
 0x3da   : > { %3429 = vmatpush3.bf16.msra.mxu1 %v3426_v2  ;;  %v2074_v2 = vld [vmem:[#allocation9 + $0x470] sm:$0xff] }
 0x3db   : > { %3431 = vmatprep.subr.bf16.mxu1 %v3430_v7  ;;  %v3490_v4 = vpack.c.bf16 %v2075_v3, %v2074_v2 }
 0x3dd   : > { %2990 = vmatmul.mubr.f32.vlgmr.msra.gmra.mrb[0].mxu1 %v1873_v15 }
 0x3de   : > { %3433 = vmatpush3.bf16.msra.mxu1 %v3430_v7  ;;  %3024 = vmatprep.mubr.f32.mxu1 %v1978_v18  ;;  %v3660_v7 = vunpack.i.l.bf16 %v3659_v5 }
 0x3df   : > { %3435 = vmatprep.subr.bf16.mxu1 %v3434_v14 }
 0x3e0   : > { %v2085_v8 = vsel %vm1871_vm3, %v3660_v7, %v3661_v6 }
 0x3e2   : > { %3437 = vmatpush3.bf16.msra.mxu1 %v3434_v14 }
 0x3e3   : > { %3439 = vmatprep.subr.bf16.mxu1 %v3438_v19 }
 0x3e6   : > { %3441 = vmatpush3.bf16.msra.mxu1 %v3438_v19 }
 0x3e7   : > { %3443 = vmatprep.subr.bf16.mxu1 %v3442_v23 }
 0x3ea   : > { %3445 = vmatpush3.bf16.msra.mxu1 %v3442_v23 }
 0x3eb   : > { %3447 = vmatprep.subr.bf16.mxu1 %v3446_v26 }
 0x3ee   : > { %3449 = vmatpush3.bf16.msra.mxu1 %v3446_v26 }
 0x3ef   : > { %3451 = vmatprep.subr.bf16.mxu1 %v3450_v29 }
 0x3f2   : > { %3453 = vmatpush3.bf16.msra.mxu1 %v3450_v29 }
 0x3f3   : > { %3455 = vmatprep.subr.bf16.mxu1 %v3454_v32 }
 0x3f6   : > { %3457 = vmatpush3.bf16.msra.mxu1 %v3454_v32 }
 0x3f7   : > { %3459 = vmatprep.subr.bf16.mxu1 %v3458_v35 }
 0x3fa   : > { %3461 = vmatpush3.bf16.msra.mxu1 %v3458_v35 }
 0x3fb   : > { %3463 = vmatprep.subr.bf16.mxu1 %v3462_v40 }
 0x3fd   : > { %3025 = vmatmul.mubr.f32.vlgmr.msra.gmra.mrb[0].mxu1 %v1979_v48  ;;  %v2816_v51 = vpop.f32.mrb[2].mxu0 }
 0x3fe   : > { %3465 = vmatpush3.bf16.msra.mxu1 %v3462_v40  ;;  %3059 = vmatprep.mubr.f32.mxu1 %v2084_v50  ;;  %v1385_v52 = vpop.f32.mrb[3].mxu0 }
 0x3ff   : > { %3467 = vmatprep.subr.bf16.mxu1 %v3466_v47 }
 0x402   : > { %3469 = vmatpush3.bf16.msra.mxu1 %v3466_v47 }
 0x403   : > { %3471 = vmatprep.subr.bf16.mxu1 %v3470_v53 }
 0x406   : > { %3473 = vmatpush3.bf16.msra.mxu1 %v3470_v53 }
 0x407   : > { %3475 = vmatprep.subr.bf16.mxu1 %v3474_v56 }
 0x40a   : > { %3477 = vmatpush3.bf16.msra.mxu1 %v3474_v56 }
 0x40b   : > { %3479 = vmatprep.subr.bf16.mxu1 %v3478_v59 }
 0x40e   : > { %3481 = vmatpush3.bf16.msra.mxu1 %v3478_v59 }
 0x40f   : > { %3483 = vmatprep.subr.bf16.mxu1 %v3482_v61 }
 0x412   : > { %3485 = vmatpush3.bf16.msra.mxu1 %v3482_v61 }
 0x413   : > { %3487 = vmatprep.subr.bf16.mxu1 %v3486_v1 }
 0x416   : > { %3489 = vmatpush3.bf16.msra.mxu1 %v3486_v1 }
 0x417   : > { %3491 = vmatprep.subr.bf16.mxu1 %v3490_v4 }
 0x41a   : > { %3493 = vmatpush3.bf16.msra.mxu1 %v3490_v4 }
 0x41d   : > { %3060 = vmatmul.mubr.f32.vlgmr.msra.gmra.mrb[0].mxu1 %v2085_v8 }
 0x4f0   : > { %v3061_v9 = vpop.f32.mrb[0].mxu1 }
 0x4f1   : > { %v3494_v11 = vadd.f32 %v3061_v9, %v2816_v51  ;;  %v2154_v12 = vpop.f32.mrb[1].mxu1 }
 0x4f2   : > { %v3495_v13 = vadd.f32 %v2154_v12, %v1385_v52 }
 0x4f3   : > { %v2173_v14 = vadd.f32 %v3494_v11, %v2316_v10 }
 0x4f4   : > { %v2172_v15 = vadd.f32 %v3495_v13, %v2316_v10 }
 0x4f5   : > { %v2175_v16 = vmax.f32 %v2173_v14, 0.0 }
 0x4f6   : > { %v2174_v17 = vmax.f32 %v2172_v15, 0.0 }
 0x4f7   : > { %2177 = vst [vmem:[%s271_s11 + $0x8] sm:$0xff] %v2175_v16 }
 0x4f8   : > { %2176 = vst [vmem:[%s271_s11] sm:$0xff] %v2174_v17 }
 0x4f9   : > { %3761 = shalt.err (!%p3758_p1)
}
 0x4fa   : > { %s3762_s10 = scalar_lea.hbm %s4185_s24, 256  ;;  %s3766_s30 = scalar_lea.hbm %s4235_s5, 512 }
 0x4fb   : > { %p3763_p13 = scmp.ne.s32.totalorder %s4185_s24, %s3762_s10  ;;  %p3767_p4 = scmp.lt.u32.totalorder %s4185_s24, %s4235_s5 }
 0x4fc   : > { %p3768_p5 = scmp.lt.u32.totalorder %s3766_s30, %s3762_s10  ;;  %p3770_p11 = scmp.lt.u32.totalorder %s3762_s10, %s4185_s24 }
 0x4fd   : > { %p3764_p6 = pnand %p3763_p13, %p4249_p0 }
 0x4fe   : > { %p3769_p8 = por %p3768_p5, %p3767_p4 }
 0x4ff   : > { %p3765_p10 = pneg %p3764_p6 }
 0x500   : > { %p3771_p2 = por %p3770_p11, %p3769_p8 }
 0x502   : > { %p3772_p3 = pnand %p3771_p2, %p3765_p10 }
 0x504   : > { %3775 = shalt.err (!%p3772_p3)
}
 0x505   : > { %s3832_s8 = smov 128  }
 0x506   : > { %3536 = dma.vmem_to_hbm [thread:$0]  (%p4249_p0), %s4180_s17, 256, %s4185_s24, %s2179_s6, %s3832_s8, %s3832_s8, %s3829_s28  }
 0x507 PF: > { %s2207_s12 = sand.u32 1, %s3806_s18   ;;  %p4250_p7 = scmp.ne.s32.totalorder %s4240_s25, 0 }
 0x508   : > { %p4251_p9 = scmp.ge.s32.totalorder %s3818_s21, 2  ;;  %s2208_s26 = scalar_lea.sflag [#allocation6], %s2207_s12 }
 0x50a   : > { %p3550_p12 = pnand %p4251_p9, %p4250_p7 }
 0x50c   : > { %3801 = dma.done.wait (!%p3550_p12), %s2208_s26, 256  }
 0x50d   : > { %3803 = vsyncadd (!%p3550_p12), %s2208_s26, 4294967040  ;;  %p19_p1 = scmp.ge.s32.totalorder %s3979_s29, 4   ;;  %s4252_s18 = smov %s3810_s19 }
 0x50e   : > { %s4253_s19 = smov %s3814_s20  ;;  %s4254_s20 = smov %s3995_s27 }
 0x50f   : > { %s4255_s21 = smov %s3979_s29  ;;  %21 = sbr.rel (!%p19_p1) target bundleno = 6 (0x6), region = 110 }
 0x516   :  { %2213 = vsyncpa [#allocation5], 1 }
 0x517   :  { %2215 = vsyncpa [#allocation5 + $0x1], 1 }
 0x518   :  { %2216 = vsyncpa [#allocation8], 1 }
 0x519   :  { %2217 = vsyncpa [#allocation6], 1 }
 0x51a   :  { %2219 = vsyncpa [#allocation6 + $0x1], 1 }

</bundles_post_ra>
